<compile_context>
chip_gen: v6e
topology: v6e:2x2x1
jax: 0.10.0
libtpu: 0.0.40
codegen_flags: <defaults>
</compile_context>

<pallas_src>
import functools

import jax
import jax.numpy as jnp
from jax import lax
from jax.experimental import pallas as pl
from jax.experimental.pallas import tpu as pltpu


LANE = 128
SUBLANE = 8


def _round_up(x, m):
    return (x + m - 1) // m * m


def _pad_gate_cols(w, h, hp):
    """Pad each of the 4 gate blocks (order [i|f|g|o]) on the last axis from h to hp."""
    if hp == h:
        return w
    lead = w.shape[:-1]
    w4 = w.reshape(lead + (4, h))
    w4 = jnp.pad(w4, [(0, 0)] * len(lead) + [(0, 0), (0, hp - h)])
    return w4.reshape(lead + (4 * hp,))


def _spec(shape, index_map, *, buffers=None):
    """BlockSpec helper; request an explicit buffer count (e.g. single-buffer
    loop-invariant weights) and fall back silently if pipeline_mode/Buffered
    is not available in the installed jax."""
    if buffers is not None:
        try:
            return pl.BlockSpec(shape, index_map, pipeline_mode=pl.Buffered(buffers))
        except Exception:
            pass
    return pl.BlockSpec(shape, index_map)


# ----------------------------- Pass 1: x @ W_ih ----------------------------- #
def _proj_kernel(x_ref, wih_ref, b_ref, gx_ref):
    # x_ref: (rows, E) bf16 ; wih_ref: (E, 4Hp) bf16 ; b_ref: (1, 4Hp) f32
    gx_ref[...] = (
        jnp.dot(x_ref[...], wih_ref[...], preferred_element_type=jnp.float32)
        + b_ref[...]
    ).astype(gx_ref.dtype)


# ----------------------------- Pass 2: recurrence --------------------------- #
def _make_recurrence_kernel(chunk_t, hp, seq_len, needs_mask, unroll):
    def kernel(gx_ref, whh_ref, hout_ref, h_scr, c_scr):
        # gx_ref : (chunk_t, Bblk, 4Hp) bf16   streamed, double-buffered
        # whh_ref: (Hp, 4Hp) bf16              resident, single-buffered
        # hout   : (Bblk, Hp) f32              written on the last chunk only
        # h_scr/c_scr: (Bblk, Hp) f32          carried across time chunks
        tc = pl.program_id(1)
        n_t = pl.num_programs(1)

        @pl.when(tc == 0)
        def _():
            h_scr[...] = jnp.zeros_like(h_scr)
            c_scr[...] = jnp.zeros_like(c_scr)

        whh = whh_ref[...]  # hoisted load, stays resident for the whole chunk

        def run_chunk(masked):
            def body():
                def step(lt, carry):
                    h, c = carry
                    gx_t = gx_ref[lt].astype(jnp.float32)          # (Bblk, 4Hp)
                    gates = gx_t + jnp.dot(
                        h.astype(jnp.bfloat16), whh,
                        preferred_element_type=jnp.float32)
                    # Lane-aligned gate slices (each block starts at a 128-lane
                    # boundary, so slicing is a free view).
                    i_g = jax.nn.sigmoid(gates[:, 0 * hp:1 * hp])
                    f_g = jax.nn.sigmoid(gates[:, 1 * hp:2 * hp])
                    g_g = jnp.tanh(gates[:, 2 * hp:3 * hp])
                    o_g = jax.nn.sigmoid(gates[:, 3 * hp:4 * hp])
                    c_new = f_g * c + i_g * g_g
                    h_new = o_g * jnp.tanh(c_new)
                    if masked:
                        valid = (tc * chunk_t + lt) < seq_len
                        c_new = jnp.where(valid, c_new, c)
                        h_new = jnp.where(valid, h_new, h)
                    return (h_new, c_new)

                # h/c carried in vregs; scratch touched once per chunk.
                h_f, c_f = lax.fori_loop(
                    0, chunk_t, step, (h_scr[...], c_scr[...]), unroll=unroll)
                h_scr[...] = h_f
                c_scr[...] = c_f
            return body

        if needs_mask:
            # Only the last (padded) chunk pays for the validity selects.
            pl.when(tc < n_t - 1)(run_chunk(False))
            pl.when(tc == n_t - 1)(run_chunk(True))
        else:
            run_chunk(False)()

        @pl.when(tc == n_t - 1)
        def _():
            hout_ref[...] = h_scr[...]

    return kernel


# ----------------------------- Pass 3: final FC ----------------------------- #
def _fc_kernel(h_ref, wfc_ref, bfc_ref, out_ref):
    # h_ref: (Bp, Hp) bf16 ; wfc_ref: (Hp, tv) bf16 ; bfc_ref: (1, tv) f32
    out_ref[...] = (
        jnp.dot(h_ref[...], wfc_ref[...], preferred_element_type=jnp.float32)
        + bfc_ref[...]
    )


def net_forward(seq_in, params, *, chunk_t_target=256):
    """seq_in: (batch, seq_len) int32 token ids. Returns (batch, n_vocab) f32 scores."""
    emb_table = params["embedding"]          # (V, E)
    w_ih = params["w_ih"]                    # (4H, E)   PyTorch layout, gates [i|f|g|o]
    w_hh = params["w_hh"]                    # (4H, H)
    b_ih = params["b_ih"]                    # (4H,)
    b_hh = params["b_hh"]                    # (4H,)
    w_fc = params["w_fc"]                    # (V, H)
    b_fc = params["b_fc"]                    # (V,)

    B, S = seq_in.shape
    V, E = emb_table.shape
    H = w_hh.shape[1]

    Hp = _round_up(H, LANE)                  # lane-aligned gate blocks
    Vp = _round_up(V, LANE)                  # lane-dense output
    Bp = _round_up(B, SUBLANE)

    # v7x megacore: split the batch across the two TensorCores when each half
    # remains a 16-row (bf16 sublane) multiple. Harmless on v5e/v6e.
    n_bblocks = 2 if (Bp % 32 == 0) else 1
    Bblk = Bp // n_bblocks

    # VMEM budget per generation, with headroom below physical capacity
    # (~48 MiB on v7x, ~96 MiB on v5e/v6e).
    try:
        vmem_cap = int(pltpu.get_tpu_info().vmem_capacity_bytes)
    except Exception:
        vmem_cap = 64 * 1024 * 1024
    budget = max(16 * 1024 * 1024, vmem_cap * 3 // 4)

    def _vmem_need(ct):
        rows = ct * Bp
        rec = (2 * ct * Bblk * 4 * Hp * 2        # gates_x blocks, double-buffered bf16
               + Hp * 4 * Hp * 2                 # W_hh, single-buffered bf16
               + 2 * Bblk * Hp * 4               # h, c scratch f32
               + 2 * Bblk * Hp * 4)              # output block
        proj = (2 * rows * E * 2                 # x blocks bf16
                + E * 4 * Hp * 2 + 4 * Hp * 4    # W_ih + bias
                + 2 * rows * 4 * Hp * 2)         # gates_x output blocks bf16
        return max(rec, proj)

    chunk_t = min(S, chunk_t_target)
    if (chunk_t * Bp) % 16:                      # keep bf16 row blocks 16-row aligned
        chunk_t += 1
    while chunk_t > 2 and 2 * _vmem_need(chunk_t) > budget:
        chunk_t = max(2, chunk_t // 2)
        if (chunk_t * Bp) % 16:
            chunk_t += 1

    n_chunks = pl.cdiv(S, chunk_t)
    S_pad = n_chunks * chunk_t
    needs_mask = S_pad != S
    unroll = True if chunk_t <= 16 else 8
    chunk_rows = chunk_t * Bp

    # --- Embedding gather directly in time-major order, bf16 activations. ---
    x_tm = jnp.take(emb_table.astype(jnp.bfloat16), seq_in.T, axis=0)   # (S, B, E)
    if Bp != B:
        x_tm = jnp.pad(x_tm, ((0, 0), (0, Bp - B), (0, 0)))
    if S_pad != S:
        x_tm = jnp.pad(x_tm, ((0, S_pad - S), (0, 0), (0, 0)))
    x_flat = x_tm.reshape(S_pad * Bp, E)

    # --- Weight prep: transpose for right-multiplication, pad gate blocks to
    # 128-lane boundaries (padded lanes stay identically zero through the
    # recurrence), bf16 for MXU operands. ---
    wih_t = _pad_gate_cols(w_ih.T, H, Hp).astype(jnp.bfloat16)               # (E, 4Hp)
    whh_t = _pad_gate_cols(w_hh.T, H, Hp)                                    # (H, 4Hp)
    whh_t = jnp.pad(whh_t, ((0, Hp - H), (0, 0))).astype(jnp.bfloat16)       # (Hp, 4Hp)
    b_all = _pad_gate_cols((b_ih + b_hh).reshape(1, 4 * H), H, Hp)
    b_all = b_all.astype(jnp.float32)                                        # (1, 4Hp)
    wfc_t = jnp.pad(w_fc.T, ((0, Hp - H), (0, Vp - V))).astype(jnp.bfloat16) # (Hp, Vp)
    bfc = jnp.pad(b_fc.reshape(1, V), ((0, 0), (0, Vp - V))).astype(jnp.float32)

    compiler = functools.partial(pltpu.CompilerParams, vmem_limit_bytes=int(budget))

    # ---------------- Pass 1: hoisted input projection (parallel grid) --------
    gx_flat = pl.pallas_call(
        _proj_kernel,
        out_shape=jax.ShapeDtypeStruct((S_pad * Bp, 4 * Hp), jnp.bfloat16),
        grid_spec=pltpu.PrefetchScalarGridSpec(
            num_scalar_prefetch=0,
            grid=(n_chunks,),
            in_specs=[
                pl.BlockSpec((chunk_rows, E), lambda i: (i, 0)),
                _spec((E, 4 * Hp), lambda i: (0, 0), buffers=1),
                _spec((1, 4 * Hp), lambda i: (0, 0), buffers=1),
            ],
            out_specs=pl.BlockSpec((chunk_rows, 4 * Hp), lambda i: (i, 0)),
        ),
        compiler_params=compiler(dimension_semantics=("parallel",)),
    )(x_flat, wih_t, b_all)

    gx = gx_flat.reshape(S_pad, Bp, 4 * Hp)      # free reshape (row-major)

    # ---------------- Pass 2: serial recurrence (batch parallel, time serial) -
    rec_kernel = _make_recurrence_kernel(chunk_t, Hp, S, needs_mask, unroll)
    h_last = pl.pallas_call(
        rec_kernel,
        out_shape=jax.ShapeDtypeStruct((Bp, Hp), jnp.float32),
        grid_spec=pltpu.PrefetchScalarGridSpec(
            num_scalar_prefetch=0,
            grid=(n_bblocks, n_chunks),
            in_specs=[
                pl.BlockSpec((chunk_t, Bblk, 4 * Hp), lambda b, t: (t, b, 0)),
                _spec((Hp, 4 * Hp), lambda b, t: (0, 0), buffers=1),
            ],
            out_specs=pl.BlockSpec((Bblk, Hp), lambda b, t: (b, 0)),
            scratch_shapes=[
                pltpu.VMEM((Bblk, Hp), jnp.float32),   # h carried across chunks
                pltpu.VMEM((Bblk, Hp), jnp.float32),   # c carried across chunks
            ],
        ),
        compiler_params=compiler(dimension_semantics=("parallel", "arbitrary")),
    )(gx, whh_t)

    # ---------------- Pass 3: final FC, tiled over vocab (parallel grid) ------
    tv = 128
    for cand in (2048, 1024, 512, 256, 128):
        if Vp % cand == 0:
            tv = cand
            break
    out = pl.pallas_call(
        _fc_kernel,
        out_shape=jax.ShapeDtypeStruct((Bp, Vp), jnp.float32),
        grid_spec=pltpu.PrefetchScalarGridSpec(
            num_scalar_prefetch=0,
            grid=(Vp // tv,),
            in_specs=[
                _spec((Bp, Hp), lambda j: (0, 0), buffers=1),
                pl.BlockSpec((Hp, tv), lambda j: (0, j)),
                pl.BlockSpec((1, tv), lambda j: (0, j)),
            ],
            out_specs=pl.BlockSpec((Bp, tv), lambda j: (0, j)),
        ),
        compiler_params=compiler(dimension_semantics=("parallel",)),
    )(h_last.astype(jnp.bfloat16), wfc_t, bfc)

    return out[:B, :V]


# ----------------------------- reference & params --------------------------- #
def net_reference(seq_in, params):
    """Pure-JAX f32 reference matching the PyTorch module semantics."""
    emb = params["embedding"][seq_in]                    # (B, S, E)
    w_ih, w_hh = params["w_ih"], params["w_hh"]
    b = params["b_ih"] + params["b_hh"]
    B = seq_in.shape[0]
    H = w_hh.shape[1]

    def step(carry, x_t):
        h, c = carry
        gates = x_t @ w_ih.T + h @ w_hh.T + b
        i, f, g, o = jnp.split(gates, 4, axis=-1)
        i = jax.nn.sigmoid(i)
        f = jax.nn.sigmoid(f)
        g = jnp.tanh(g)
        o = jax.nn.sigmoid(o)
        c = f * c + i * g
        h = o * jnp.tanh(c)
        return (h, c), None

    init = (jnp.zeros((B, H), jnp.float32), jnp.zeros((B, H), jnp.float32))
    (h, _), _ = lax.scan(step, init, jnp.swapaxes(emb, 0, 1))
    return h @ params["w_fc"].T + params["b_fc"]


def init_params(key, n_vocab, embedding_dim, hidden_dim):
    ks = jax.random.split(key, 7)
    scale = 0.1
    return {
        "embedding": scale * jax.random.normal(ks[0], (n_vocab, embedding_dim), jnp.float32),
        "w_ih": scale * jax.random.normal(ks[1], (4 * hidden_dim, embedding_dim), jnp.float32),
        "w_hh": scale * jax.random.normal(ks[2], (4 * hidden_dim, hidden_dim), jnp.float32),
        "b_ih": scale * jax.random.normal(ks[3], (4 * hidden_dim,), jnp.float32),
        "b_hh": scale * jax.random.normal(ks[4], (4 * hidden_dim,), jnp.float32),
        "w_fc": scale * jax.random.normal(ks[5], (n_vocab, hidden_dim), jnp.float32),
        "b_fc": scale * jax.random.normal(ks[6], (n_vocab,), jnp.float32),
    }


if __name__ == "__main__":
    n_vocab, embedding_dim, hidden_dim = 128, 32, 32
    batch, seq_len = 8, 8

    key = jax.random.PRNGKey(0)
    pkey, dkey = jax.random.split(key)
    params = init_params(pkey, n_vocab, embedding_dim, hidden_dim)
    seq_in = jax.random.randint(dkey, (batch, seq_len), 0, n_vocab, dtype=jnp.int32)

    out = jax.jit(net_forward)(seq_in, params)
    jax.block_until_ready(out)
    assert out.shape == (batch, n_vocab)

    # Tolerance-asserted f32 reference check (kernel uses bf16 MXU operands).
    ref = net_reference(seq_in, params)
    err = float(jnp.max(jnp.abs(out - ref)))
    assert err < 5e-2, f"max abs error vs reference: {err}"
    print("KERNEL_OK")
</pallas_src>

<mosaic_0001>
module attributes {stable_mosaic.version = 11 : i64} {
  func.func @_proj_kernel(%arg0: i32, %arg1: memref<64x32xbf16, #tpu.memory_space<vmem>>, %arg2: memref<32x512xbf16, #tpu.memory_space<vmem>>, %arg3: memref<1x512xf32, #tpu.memory_space<vmem>>, %arg4: memref<64x512xbf16, #tpu.memory_space<vmem>>) attributes {dimension_semantics = [#tpu.dimension_semantics<parallel>], iteration_bounds = array<i64: 1>, scalar_prefetch = 0 : i64, scratch_operands = 0 : i64, tpu.core_type = #tpu.core_type<tc>, window_params = [{transform_indices = @transform_0, window_bounds = array<i64: 64, 32>}, {pipeline_mode = #tpu.pipeline_mode<synchronous>, transform_indices = @transform_1, window_bounds = array<i64: 32, 512>}, {pipeline_mode = #tpu.pipeline_mode<synchronous>, transform_indices = @transform_2, window_bounds = array<i64: 1, 512>}, {transform_indices = @transform_3, window_bounds = array<i64: 64, 512>}]} {
    %c0 = arith.constant 0 : index
    %c0_0 = arith.constant 0 : index
    %0 = vector.load %arg1[%c0, %c0_0] : memref<64x32xbf16, #tpu.memory_space<vmem>>, vector<64x32xbf16>
    %c0_1 = arith.constant 0 : index
    %c0_2 = arith.constant 0 : index
    %1 = vector.load %arg2[%c0_1, %c0_2] : memref<32x512xbf16, #tpu.memory_space<vmem>>, vector<32x512xbf16>
    %cst = arith.constant dense<0.000000e+00> : vector<64x512xf32>
    %2 = tpu.matmul %0, %1, %cst {dimension_numbers = #tpu.dot_dimension_numbers<[1], [0], [0], [1], [0, 0, 1, 1], [], []>} : vector<64x32xbf16>, vector<32x512xbf16>, vector<64x512xf32> -> vector<64x512xf32>
    %c0_3 = arith.constant 0 : index
    %c0_4 = arith.constant 0 : index
    %3 = vector.load %arg3[%c0_3, %c0_4] : memref<1x512xf32, #tpu.memory_space<vmem>>, vector<1x512xf32>
    %4 = vector.broadcast %3 : vector<1x512xf32> to vector<64x512xf32>
    %5 = arith.addf %2, %4 : vector<64x512xf32>
    %6 = arith.truncf %5 : vector<64x512xf32> to vector<64x512xbf16>
    %c0_5 = arith.constant 0 : index
    %c0_6 = arith.constant 0 : index
    %7 = vector.load %arg4[%c0_5, %c0_6] : memref<64x512xbf16, #tpu.memory_space<vmem>>, vector<64x512xbf16>
    tpu.vector_store %arg4[%c0_5, %c0_6], %6 {strides = array<i32>} : memref<64x512xbf16, #tpu.memory_space<vmem>>, vector<64x512xbf16>,
    return
  }
  func.func @transform_0(%arg0: i32) -> (i32, i32) {
    %c0_i32 = arith.constant 0 : i32
    %c0_i32_0 = arith.constant 0 : i32
    return %arg0, %c0_i32 : i32, i32
  }
  func.func @transform_1(%arg0: i32) -> (i32, i32) {
    %c0_i32 = arith.constant 0 : i32
    %c0_i32_0 = arith.constant 0 : i32
    %c0_i32_1 = arith.constant 0 : i32
    return %c0_i32, %c0_i32_0 : i32, i32
  }
  func.func @transform_2(%arg0: i32) -> (i32, i32) {
    %c0_i32 = arith.constant 0 : i32
    %c0_i32_0 = arith.constant 0 : i32
    %c0_i32_1 = arith.constant 0 : i32
    return %c0_i32, %c0_i32_0 : i32, i32
  }
  func.func @transform_3(%arg0: i32) -> (i32, i32) {
    %c0_i32 = arith.constant 0 : i32
    %c0_i32_0 = arith.constant 0 : i32
    return %arg0, %c0_i32 : i32, i32
  }
}

module attributes {stable_mosaic.version = 11 : i64} {
  func.func @_fc_kernel(%arg0: i32, %arg1: memref<8x128xbf16, #tpu.memory_space<vmem>>, %arg2: memref<128x128xbf16, #tpu.memory_space<vmem>>, %arg3: memref<1x128xf32, #tpu.memory_space<vmem>>, %arg4: memref<8x128xf32, #tpu.memory_space<vmem>>) attributes {dimension_semantics = [#tpu.dimension_semantics<parallel>], iteration_bounds = array<i64: 1>, scalar_prefetch = 0 : i64, scratch_operands = 0 : i64, tpu.core_type = #tpu.core_type<tc>, window_params = [{pipeline_mode = #tpu.pipeline_mode<synchronous>, transform_indices = @transform_0, window_bounds = array<i64: 8, 128>}, {transform_indices = @transform_1, window_bounds = array<i64: 128, 128>}, {transform_indices = @transform_2, window_bounds = array<i64: 1, 128>}, {transform_indices = @transform_3, window_bounds = array<i64: 8, 128>}]} {
    %c0 = arith.constant 0 : index
    %c0_0 = arith.constant 0 : index
    %0 = vector.load %arg1[%c0, %c0_0] : memref<8x128xbf16, #tpu.memory_space<vmem>>, vector<8x128xbf16>
    %c0_1 = arith.constant 0 : index
    %c0_2 = arith.constant 0 : index
    %1 = vector.load %arg2[%c0_1, %c0_2] : memref<128x128xbf16, #tpu.memory_space<vmem>>, vector<128x128xbf16>
    %cst = arith.constant dense<0.000000e+00> : vector<8x128xf32>
    %2 = tpu.matmul %0, %1, %cst {dimension_numbers = #tpu.dot_dimension_numbers<[1], [0], [0], [1], [0, 0, 1, 1], [], []>} : vector<8x128xbf16>, vector<128x128xbf16>, vector<8x128xf32> -> vector<8x128xf32>
    %c0_3 = arith.constant 0 : index
    %c0_4 = arith.constant 0 : index
    %3 = vector.load %arg3[%c0_3, %c0_4] : memref<1x128xf32, #tpu.memory_space<vmem>>, vector<1x128xf32>
    %4 = vector.broadcast %3 : vector<1x128xf32> to vector<8x128xf32>
    %5 = arith.addf %2, %4 : vector<8x128xf32>
    %c0_5 = arith.constant 0 : index
    %c0_6 = arith.constant 0 : index
    %6 = vector.load %arg4[%c0_5, %c0_6] : memref<8x128xf32, #tpu.memory_space<vmem>>, vector<8x128xf32>
    tpu.vector_store %arg4[%c0_5, %c0_6], %5 {strides = array<i32>} : memref<8x128xf32, #tpu.memory_space<vmem>>, vector<8x128xf32>,
    return
  }
  func.func @transform_0(%arg0: i32) -> (i32, i32) {
    %c0_i32 = arith.constant 0 : i32
    %c0_i32_0 = arith.constant 0 : i32
    %c0_i32_1 = arith.constant 0 : i32
    return %c0_i32, %c0_i32_0 : i32, i32
  }
  func.func @transform_1(%arg0: i32) -> (i32, i32) {
    %c0_i32 = arith.constant 0 : i32
    %c0_i32_0 = arith.constant 0 : i32
    return %c0_i32, %arg0 : i32, i32
  }
  func.func @transform_2(%arg0: i32) -> (i32, i32) {
    %c0_i32 = arith.constant 0 : i32
    %c0_i32_0 = arith.constant 0 : i32
    return %c0_i32, %arg0 : i32, i32
  }
  func.func @transform_3(%arg0: i32) -> (i32, i32) {
    %c0_i32 = arith.constant 0 : i32
    %c0_i32_0 = arith.constant 0 : i32
    return %c0_i32, %arg0 : i32, i32
  }
}

module attributes {stable_mosaic.version = 11 : i64} {
  func.func @kernel(%arg0: i32, %arg1: i32, %arg2: memref<8x8x512xbf16, #tpu.memory_space<vmem>>, %arg3: memref<128x512xbf16, #tpu.memory_space<vmem>>, %arg4: memref<8x128xf32, #tpu.memory_space<vmem>>, %arg5: memref<8x128xf32, #tpu.memory_space<vmem>>, %arg6: memref<8x128xf32, #tpu.memory_space<vmem>>) attributes {dimension_semantics = [#tpu.dimension_semantics<parallel>, #tpu.dimension_semantics<arbitrary>], iteration_bounds = array<i64: 1, 1>, scalar_prefetch = 0 : i64, scratch_operands = 2 : i64, tpu.core_type = #tpu.core_type<tc>, window_params = [{transform_indices = @transform_0, window_bounds = array<i64: 8, 8, 512>}, {pipeline_mode = #tpu.pipeline_mode<synchronous>, transform_indices = @transform_1, window_bounds = array<i64: 128, 512>}, {transform_indices = @transform_2, window_bounds = array<i64: 8, 128>}]} {
    %c0_i32 = arith.constant 0 : i32
    %0 = arith.cmpi eq, %arg1, %c0_i32 : i32
    %1 = arith.extui %0 : i1 to i32
    %c0_i32_0 = arith.constant 0 : i32
    %2 = arith.cmpi ne, %1, %c0_i32_0 : i32
    scf.if %2 {
      %cst_60 = arith.constant 0.000000e+00 : f32
      %267 = vector.broadcast %cst_60 : f32 to vector<8x128xf32>
      %c0_61 = arith.constant 0 : index
      %c0_62 = arith.constant 0 : index
      %268 = vector.load %arg5[%c0_61, %c0_62] : memref<8x128xf32, #tpu.memory_space<vmem>>, vector<8x128xf32>
      tpu.vector_store %arg5[%c0_61, %c0_62], %267 {strides = array<i32>} : memref<8x128xf32, #tpu.memory_space<vmem>>, vector<8x128xf32>,
      %cst_63 = arith.constant 0.000000e+00 : f32
      %269 = vector.broadcast %cst_63 : f32 to vector<8x128xf32>
      %c0_64 = arith.constant 0 : index
      %c0_65 = arith.constant 0 : index
      %270 = vector.load %arg6[%c0_64, %c0_65] : memref<8x128xf32, #tpu.memory_space<vmem>>, vector<8x128xf32>
      tpu.vector_store %arg6[%c0_64, %c0_65], %269 {strides = array<i32>} : memref<8x128xf32, #tpu.memory_space<vmem>>, vector<8x128xf32>,
    } else {
    }
    %c0 = arith.constant 0 : index
    %c0_1 = arith.constant 0 : index
    %3 = vector.load %arg3[%c0, %c0_1] : memref<128x512xbf16, #tpu.memory_space<vmem>>, vector<128x512xbf16>
    %c0_2 = arith.constant 0 : index
    %c0_3 = arith.constant 0 : index
    %4 = vector.load %arg5[%c0_2, %c0_3] : memref<8x128xf32, #tpu.memory_space<vmem>>, vector<8x128xf32>
    %c0_4 = arith.constant 0 : index
    %c0_5 = arith.constant 0 : index
    %5 = vector.load %arg6[%c0_4, %c0_5] : memref<8x128xf32, #tpu.memory_space<vmem>>, vector<8x128xf32>
    %c0_i32_6 = arith.constant 0 : i32
    %6 = arith.index_cast %c0_i32_6 : i32 to index
    %c0_7 = arith.constant 0 : index
    %c0_8 = arith.constant 0 : index
    %7 = vector.load %arg2[%6, %c0_7, %c0_8] : memref<8x8x512xbf16, #tpu.memory_space<vmem>>, vector<1x8x512xbf16>
    %8 = vector.shape_cast %7 : vector<1x8x512xbf16> to vector<8x512xbf16>
    %9 = arith.extf %8 : vector<8x512xbf16> to vector<8x512xf32>
    %10 = arith.truncf %4 : vector<8x128xf32> to vector<8x128xbf16>
    %cst = arith.constant dense<0.000000e+00> : vector<8x512xf32>
    %11 = tpu.matmul %10, %3, %cst {dimension_numbers = #tpu.dot_dimension_numbers<[1], [0], [0], [1], [0, 0, 1, 1], [], []>} : vector<8x128xbf16>, vector<128x512xbf16>, vector<8x512xf32> -> vector<8x512xf32>
    %12 = arith.addf %9, %11 : vector<8x512xf32>
    %13 = vector.extract_strided_slice %12 {offsets = [0, 0], sizes = [8, 128], strides = [1, 1]} : vector<8x512xf32> to vector<8x128xf32>
    %14 = arith.negf %13 : vector<8x128xf32>
    %15 = math.exp %14 : vector<8x128xf32>
    %cst_9 = arith.constant 1.000000e+00 : f32
    %16 = vector.broadcast %cst_9 : f32 to vector<8x128xf32>
    %17 = arith.addf %16, %15 : vector<8x128xf32>
    %18 = arith.divf %16, %17 : vector<8x128xf32>
    %19 = vector.extract_strided_slice %12 {offsets = [0, 128], sizes = [8, 128], strides = [1, 1]} : vector<8x512xf32> to vector<8x128xf32>
    %20 = arith.negf %19 : vector<8x128xf32>
    %21 = math.exp %20 : vector<8x128xf32>
    %cst_10 = arith.constant 1.000000e+00 : f32
    %22 = vector.broadcast %cst_10 : f32 to vector<8x128xf32>
    %23 = arith.addf %22, %21 : vector<8x128xf32>
    %24 = arith.divf %22, %23 : vector<8x128xf32>
    %25 = vector.extract_strided_slice %12 {offsets = [0, 256], sizes = [8, 128], strides = [1, 1]} : vector<8x512xf32> to vector<8x128xf32>
    %26 = math.tanh %25 : vector<8x128xf32>
    %27 = vector.extract_strided_slice %12 {offsets = [0, 384], sizes = [8, 128], strides = [1, 1]} : vector<8x512xf32> to vector<8x128xf32>
    %28 = arith.negf %27 : vector<8x128xf32>
    %29 = math.exp %28 : vector<8x128xf32>
    %cst_11 = arith.constant 1.000000e+00 : f32
    %30 = vector.broadcast %cst_11 : f32 to vector<8x128xf32>
    %31 = arith.addf %30, %29 : vector<8x128xf32>
    %32 = arith.divf %30, %31 : vector<8x128xf32>
    %33 = arith.mulf %24, %5 : vector<8x128xf32>
    %34 = arith.mulf %18, %26 : vector<8x128xf32>
    %35 = arith.addf %33, %34 : vector<8x128xf32>
    %36 = math.tanh %35 : vector<8x128xf32>
    %37 = arith.mulf %32, %36 : vector<8x128xf32>
    %c1_i32 = arith.constant 1 : i32
    %38 = arith.index_cast %c1_i32 : i32 to index
    %c0_12 = arith.constant 0 : index
    %c0_13 = arith.constant 0 : index
    %39 = vector.load %arg2[%38, %c0_12, %c0_13] : memref<8x8x512xbf16, #tpu.memory_space<vmem>>, vector<1x8x512xbf16>
    %40 = vector.shape_cast %39 : vector<1x8x512xbf16> to vector<8x512xbf16>
    %41 = arith.extf %40 : vector<8x512xbf16> to vector<8x512xf32>
    %42 = arith.truncf %37 : vector<8x128xf32> to vector<8x128xbf16>
    %cst_14 = arith.constant dense<0.000000e+00> : vector<8x512xf32>
    %43 = tpu.matmul %42, %3, %cst_14 {dimension_numbers = #tpu.dot_dimension_numbers<[1], [0], [0], [1], [0, 0, 1, 1], [], []>} : vector<8x128xbf16>, vector<128x512xbf16>, vector<8x512xf32> -> vector<8x512xf32>
    %44 = arith.addf %41, %43 : vector<8x512xf32>
    %45 = vector.extract_strided_slice %44 {offsets = [0, 0], sizes = [8, 128], strides = [1, 1]} : vector<8x512xf32> to vector<8x128xf32>
    %46 = arith.negf %45 : vector<8x128xf32>
    %47 = math.exp %46 : vector<8x128xf32>
    %cst_15 = arith.constant 1.000000e+00 : f32
    %48 = vector.broadcast %cst_15 : f32 to vector<8x128xf32>
    %49 = arith.addf %48, %47 : vector<8x128xf32>
    %50 = arith.divf %48, %49 : vector<8x128xf32>
    %51 = vector.extract_strided_slice %44 {offsets = [0, 128], sizes = [8, 128], strides = [1, 1]} : vector<8x512xf32> to vector<8x128xf32>
    %52 = arith.negf %51 : vector<8x128xf32>
    %53 = math.exp %52 : vector<8x128xf32>
    %cst_16 = arith.constant 1.000000e+00 : f32
    %54 = vector.broadcast %cst_16 : f32 to vector<8x128xf32>
    %55 = arith.addf %54, %53 : vector<8x128xf32>
    %56 = arith.divf %54, %55 : vector<8x128xf32>
    %57 = vector.extract_strided_slice %44 {offsets = [0, 256], sizes = [8, 128], strides = [1, 1]} : vector<8x512xf32> to vector<8x128xf32>
    %58 = math.tanh %57 : vector<8x128xf32>
    %59 = vector.extract_strided_slice %44 {offsets = [0, 384], sizes = [8, 128], strides = [1, 1]} : vector<8x512xf32> to vector<8x128xf32>
    %60 = arith.negf %59 : vector<8x128xf32>
    %61 = math.exp %60 : vector<8x128xf32>
    %cst_17 = arith.constant 1.000000e+00 : f32
    %62 = vector.broadcast %cst_17 : f32 to vector<8x128xf32>
    %63 = arith.addf %62, %61 : vector<8x128xf32>
    %64 = arith.divf %62, %63 : vector<8x128xf32>
    %65 = arith.mulf %56, %35 : vector<8x128xf32>
    %66 = arith.mulf %50, %58 : vector<8x128xf32>
    %67 = arith.addf %65, %66 : vector<8x128xf32>
    %68 = math.tanh %67 : vector<8x128xf32>
    %69 = arith.mulf %64, %68 : vector<8x128xf32>
    %c2_i32 = arith.constant 2 : i32
    %70 = arith.index_cast %c2_i32 : i32 to index
    %c0_18 = arith.constant 0 : index
    %c0_19 = arith.constant 0 : index
    %71 = vector.load %arg2[%70, %c0_18, %c0_19] : memref<8x8x512xbf16, #tpu.memory_space<vmem>>, vector<1x8x512xbf16>
    %72 = vector.shape_cast %71 : vector<1x8x512xbf16> to vector<8x512xbf16>
    %73 = arith.extf %72 : vector<8x512xbf16> to vector<8x512xf32>
    %74 = arith.truncf %69 : vector<8x128xf32> to vector<8x128xbf16>
    %cst_20 = arith.constant dense<0.000000e+00> : vector<8x512xf32>
    %75 = tpu.matmul %74, %3, %cst_20 {dimension_numbers = #tpu.dot_dimension_numbers<[1], [0], [0], [1], [0, 0, 1, 1], [], []>} : vector<8x128xbf16>, vector<128x512xbf16>, vector<8x512xf32> -> vector<8x512xf32>
    %76 = arith.addf %73, %75 : vector<8x512xf32>
    %77 = vector.extract_strided_slice %76 {offsets = [0, 0], sizes = [8, 128], strides = [1, 1]} : vector<8x512xf32> to vector<8x128xf32>
    %78 = arith.negf %77 : vector<8x128xf32>
    %79 = math.exp %78 : vector<8x128xf32>
    %cst_21 = arith.constant 1.000000e+00 : f32
    %80 = vector.broadcast %cst_21 : f32 to vector<8x128xf32>
    %81 = arith.addf %80, %79 : vector<8x128xf32>
    %82 = arith.divf %80, %81 : vector<8x128xf32>
    %83 = vector.extract_strided_slice %76 {offsets = [0, 128], sizes = [8, 128], strides = [1, 1]} : vector<8x512xf32> to vector<8x128xf32>
    %84 = arith.negf %83 : vector<8x128xf32>
    %85 = math.exp %84 : vector<8x128xf32>
    %cst_22 = arith.constant 1.000000e+00 : f32
    %86 = vector.broadcast %cst_22 : f32 to vector<8x128xf32>
    %87 = arith.addf %86, %85 : vector<8x128xf32>
    %88 = arith.divf %86, %87 : vector<8x128xf32>
    %89 = vector.extract_strided_slice %76 {offsets = [0, 256], sizes = [8, 128], strides = [1, 1]} : vector<8x512xf32> to vector<8x128xf32>
    %90 = math.tanh %89 : vector<8x128xf32>
    %91 = vector.extract_strided_slice %76 {offsets = [0, 384], sizes = [8, 128], strides = [1, 1]} : vector<8x512xf32> to vector<8x128xf32>
    %92 = arith.negf %91 : vector<8x128xf32>
    %93 = math.exp %92 : vector<8x128xf32>
    %cst_23 = arith.constant 1.000000e+00 : f32
    %94 = vector.broadcast %cst_23 : f32 to vector<8x128xf32>
    %95 = arith.addf %94, %93 : vector<8x128xf32>
    %96 = arith.divf %94, %95 : vector<8x128xf32>
    %97 = arith.mulf %88, %67 : vector<8x128xf32>
    %98 = arith.mulf %82, %90 : vector<8x128xf32>
    %99 = arith.addf %97, %98 : vector<8x128xf32>
    %100 = math.tanh %99 : vector<8x128xf32>
    %101 = arith.mulf %96, %100 : vector<8x128xf32>
    %c3_i32 = arith.constant 3 : i32
    %102 = arith.index_cast %c3_i32 : i32 to index
    %c0_24 = arith.constant 0 : index
    %c0_25 = arith.constant 0 : index
    %103 = vector.load %arg2[%102, %c0_24, %c0_25] : memref<8x8x512xbf16, #tpu.memory_space<vmem>>, vector<1x8x512xbf16>
    %104 = vector.shape_cast %103 : vector<1x8x512xbf16> to vector<8x512xbf16>
    %105 = arith.extf %104 : vector<8x512xbf16> to vector<8x512xf32>
    %106 = arith.truncf %101 : vector<8x128xf32> to vector<8x128xbf16>
    %cst_26 = arith.constant dense<0.000000e+00> : vector<8x512xf32>
    %107 = tpu.matmul %106, %3, %cst_26 {dimension_numbers = #tpu.dot_dimension_numbers<[1], [0], [0], [1], [0, 0, 1, 1], [], []>} : vector<8x128xbf16>, vector<128x512xbf16>, vector<8x512xf32> -> vector<8x512xf32>
    %108 = arith.addf %105, %107 : vector<8x512xf32>
    %109 = vector.extract_strided_slice %108 {offsets = [0, 0], sizes = [8, 128], strides = [1, 1]} : vector<8x512xf32> to vector<8x128xf32>
    %110 = arith.negf %109 : vector<8x128xf32>
    %111 = math.exp %110 : vector<8x128xf32>
    %cst_27 = arith.constant 1.000000e+00 : f32
    %112 = vector.broadcast %cst_27 : f32 to vector<8x128xf32>
    %113 = arith.addf %112, %111 : vector<8x128xf32>
    %114 = arith.divf %112, %113 : vector<8x128xf32>
    %115 = vector.extract_strided_slice %108 {offsets = [0, 128], sizes = [8, 128], strides = [1, 1]} : vector<8x512xf32> to vector<8x128xf32>
    %116 = arith.negf %115 : vector<8x128xf32>
    %117 = math.exp %116 : vector<8x128xf32>
    %cst_28 = arith.constant 1.000000e+00 : f32
    %118 = vector.broadcast %cst_28 : f32 to vector<8x128xf32>
    %119 = arith.addf %118, %117 : vector<8x128xf32>
    %120 = arith.divf %118, %119 : vector<8x128xf32>
    %121 = vector.extract_strided_slice %108 {offsets = [0, 256], sizes = [8, 128], strides = [1, 1]} : vector<8x512xf32> to vector<8x128xf32>
    %122 = math.tanh %121 : vector<8x128xf32>
    %123 = vector.extract_strided_slice %108 {offsets = [0, 384], sizes = [8, 128], strides = [1, 1]} : vector<8x512xf32> to vector<8x128xf32>
    %124 = arith.negf %123 : vector<8x128xf32>
    %125 = math.exp %124 : vector<8x128xf32>
    %cst_29 = arith.constant 1.000000e+00 : f32
    %126 = vector.broadcast %cst_29 : f32 to vector<8x128xf32>
    %127 = arith.addf %126, %125 : vector<8x128xf32>
    %128 = arith.divf %126, %127 : vector<8x128xf32>
    %129 = arith.mulf %120, %99 : vector<8x128xf32>
    %130 = arith.mulf %114, %122 : vector<8x128xf32>
    %131 = arith.addf %129, %130 : vector<8x128xf32>
    %132 = math.tanh %131 : vector<8x128xf32>
    %133 = arith.mulf %128, %132 : vector<8x128xf32>
    %c4_i32 = arith.constant 4 : i32
    %134 = arith.index_cast %c4_i32 : i32 to index
    %c0_30 = arith.constant 0 : index
    %c0_31 = arith.constant 0 : index
    %135 = vector.load %arg2[%134, %c0_30, %c0_31] : memref<8x8x512xbf16, #tpu.memory_space<vmem>>, vector<1x8x512xbf16>
    %136 = vector.shape_cast %135 : vector<1x8x512xbf16> to vector<8x512xbf16>
    %137 = arith.extf %136 : vector<8x512xbf16> to vector<8x512xf32>
    %138 = arith.truncf %133 : vector<8x128xf32> to vector<8x128xbf16>
    %cst_32 = arith.constant dense<0.000000e+00> : vector<8x512xf32>
    %139 = tpu.matmul %138, %3, %cst_32 {dimension_numbers = #tpu.dot_dimension_numbers<[1], [0], [0], [1], [0, 0, 1, 1], [], []>} : vector<8x128xbf16>, vector<128x512xbf16>, vector<8x512xf32> -> vector<8x512xf32>
    %140 = arith.addf %137, %139 : vector<8x512xf32>
    %141 = vector.extract_strided_slice %140 {offsets = [0, 0], sizes = [8, 128], strides = [1, 1]} : vector<8x512xf32> to vector<8x128xf32>
    %142 = arith.negf %141 : vector<8x128xf32>
    %143 = math.exp %142 : vector<8x128xf32>
    %cst_33 = arith.constant 1.000000e+00 : f32
    %144 = vector.broadcast %cst_33 : f32 to vector<8x128xf32>
    %145 = arith.addf %144, %143 : vector<8x128xf32>
    %146 = arith.divf %144, %145 : vector<8x128xf32>
    %147 = vector.extract_strided_slice %140 {offsets = [0, 128], sizes = [8, 128], strides = [1, 1]} : vector<8x512xf32> to vector<8x128xf32>
    %148 = arith.negf %147 : vector<8x128xf32>
    %149 = math.exp %148 : vector<8x128xf32>
    %cst_34 = arith.constant 1.000000e+00 : f32
    %150 = vector.broadcast %cst_34 : f32 to vector<8x128xf32>
    %151 = arith.addf %150, %149 : vector<8x128xf32>
    %152 = arith.divf %150, %151 : vector<8x128xf32>
    %153 = vector.extract_strided_slice %140 {offsets = [0, 256], sizes = [8, 128], strides = [1, 1]} : vector<8x512xf32> to vector<8x128xf32>
    %154 = math.tanh %153 : vector<8x128xf32>
    %155 = vector.extract_strided_slice %140 {offsets = [0, 384], sizes = [8, 128], strides = [1, 1]} : vector<8x512xf32> to vector<8x128xf32>
    %156 = arith.negf %155 : vector<8x128xf32>
    %157 = math.exp %156 : vector<8x128xf32>
    %cst_35 = arith.constant 1.000000e+00 : f32
    %158 = vector.broadcast %cst_35 : f32 to vector<8x128xf32>
    %159 = arith.addf %158, %157 : vector<8x128xf32>
    %160 = arith.divf %158, %159 : vector<8x128xf32>
    %161 = arith.mulf %152, %131 : vector<8x128xf32>
    %162 = arith.mulf %146, %154 : vector<8x128xf32>
    %163 = arith.addf %161, %162 : vector<8x128xf32>
    %164 = math.tanh %163 : vector<8x128xf32>
    %165 = arith.mulf %160, %164 : vector<8x128xf32>
    %c5_i32 = arith.constant 5 : i32
    %166 = arith.index_cast %c5_i32 : i32 to index
    %c0_36 = arith.constant 0 : index
    %c0_37 = arith.constant 0 : index
    %167 = vector.load %arg2[%166, %c0_36, %c0_37] : memref<8x8x512xbf16, #tpu.memory_space<vmem>>, vector<1x8x512xbf16>
    %168 = vector.shape_cast %167 : vector<1x8x512xbf16> to vector<8x512xbf16>
    %169 = arith.extf %168 : vector<8x512xbf16> to vector<8x512xf32>
    %170 = arith.truncf %165 : vector<8x128xf32> to vector<8x128xbf16>
    %cst_38 = arith.constant dense<0.000000e+00> : vector<8x512xf32>
    %171 = tpu.matmul %170, %3, %cst_38 {dimension_numbers = #tpu.dot_dimension_numbers<[1], [0], [0], [1], [0, 0, 1, 1], [], []>} : vector<8x128xbf16>, vector<128x512xbf16>, vector<8x512xf32> -> vector<8x512xf32>
    %172 = arith.addf %169, %171 : vector<8x512xf32>
    %173 = vector.extract_strided_slice %172 {offsets = [0, 0], sizes = [8, 128], strides = [1, 1]} : vector<8x512xf32> to vector<8x128xf32>
    %174 = arith.negf %173 : vector<8x128xf32>
    %175 = math.exp %174 : vector<8x128xf32>
    %cst_39 = arith.constant 1.000000e+00 : f32
    %176 = vector.broadcast %cst_39 : f32 to vector<8x128xf32>
    %177 = arith.addf %176, %175 : vector<8x128xf32>
    %178 = arith.divf %176, %177 : vector<8x128xf32>
    %179 = vector.extract_strided_slice %172 {offsets = [0, 128], sizes = [8, 128], strides = [1, 1]} : vector<8x512xf32> to vector<8x128xf32>
    %180 = arith.negf %179 : vector<8x128xf32>
    %181 = math.exp %180 : vector<8x128xf32>
    %cst_40 = arith.constant 1.000000e+00 : f32
    %182 = vector.broadcast %cst_40 : f32 to vector<8x128xf32>
    %183 = arith.addf %182, %181 : vector<8x128xf32>
    %184 = arith.divf %182, %183 : vector<8x128xf32>
    %185 = vector.extract_strided_slice %172 {offsets = [0, 256], sizes = [8, 128], strides = [1, 1]} : vector<8x512xf32> to vector<8x128xf32>
    %186 = math.tanh %185 : vector<8x128xf32>
    %187 = vector.extract_strided_slice %172 {offsets = [0, 384], sizes = [8, 128], strides = [1, 1]} : vector<8x512xf32> to vector<8x128xf32>
    %188 = arith.negf %187 : vector<8x128xf32>
    %189 = math.exp %188 : vector<8x128xf32>
    %cst_41 = arith.constant 1.000000e+00 : f32
    %190 = vector.broadcast %cst_41 : f32 to vector<8x128xf32>
    %191 = arith.addf %190, %189 : vector<8x128xf32>
    %192 = arith.divf %190, %191 : vector<8x128xf32>
    %193 = arith.mulf %184, %163 : vector<8x128xf32>
    %194 = arith.mulf %178, %186 : vector<8x128xf32>
    %195 = arith.addf %193, %194 : vector<8x128xf32>
    %196 = math.tanh %195 : vector<8x128xf32>
    %197 = arith.mulf %192, %196 : vector<8x128xf32>
    %c6_i32 = arith.constant 6 : i32
    %198 = arith.index_cast %c6_i32 : i32 to index
    %c0_42 = arith.constant 0 : index
    %c0_43 = arith.constant 0 : index
    %199 = vector.load %arg2[%198, %c0_42, %c0_43] : memref<8x8x512xbf16, #tpu.memory_space<vmem>>, vector<1x8x512xbf16>
    %200 = vector.shape_cast %199 : vector<1x8x512xbf16> to vector<8x512xbf16>
    %201 = arith.extf %200 : vector<8x512xbf16> to vector<8x512xf32>
    %202 = arith.truncf %197 : vector<8x128xf32> to vector<8x128xbf16>
    %cst_44 = arith.constant dense<0.000000e+00> : vector<8x512xf32>
    %203 = tpu.matmul %202, %3, %cst_44 {dimension_numbers = #tpu.dot_dimension_numbers<[1], [0], [0], [1], [0, 0, 1, 1], [], []>} : vector<8x128xbf16>, vector<128x512xbf16>, vector<8x512xf32> -> vector<8x512xf32>
    %204 = arith.addf %201, %203 : vector<8x512xf32>
    %205 = vector.extract_strided_slice %204 {offsets = [0, 0], sizes = [8, 128], strides = [1, 1]} : vector<8x512xf32> to vector<8x128xf32>
    %206 = arith.negf %205 : vector<8x128xf32>
    %207 = math.exp %206 : vector<8x128xf32>
    %cst_45 = arith.constant 1.000000e+00 : f32
    %208 = vector.broadcast %cst_45 : f32 to vector<8x128xf32>
    %209 = arith.addf %208, %207 : vector<8x128xf32>
    %210 = arith.divf %208, %209 : vector<8x128xf32>
    %211 = vector.extract_strided_slice %204 {offsets = [0, 128], sizes = [8, 128], strides = [1, 1]} : vector<8x512xf32> to vector<8x128xf32>
    %212 = arith.negf %211 : vector<8x128xf32>
    %213 = math.exp %212 : vector<8x128xf32>
    %cst_46 = arith.constant 1.000000e+00 : f32
    %214 = vector.broadcast %cst_46 : f32 to vector<8x128xf32>
    %215 = arith.addf %214, %213 : vector<8x128xf32>
    %216 = arith.divf %214, %215 : vector<8x128xf32>
    %217 = vector.extract_strided_slice %204 {offsets = [0, 256], sizes = [8, 128], strides = [1, 1]} : vector<8x512xf32> to vector<8x128xf32>
    %218 = math.tanh %217 : vector<8x128xf32>
    %219 = vector.extract_strided_slice %204 {offsets = [0, 384], sizes = [8, 128], strides = [1, 1]} : vector<8x512xf32> to vector<8x128xf32>
    %220 = arith.negf %219 : vector<8x128xf32>
    %221 = math.exp %220 : vector<8x128xf32>
    %cst_47 = arith.constant 1.000000e+00 : f32
    %222 = vector.broadcast %cst_47 : f32 to vector<8x128xf32>
    %223 = arith.addf %222, %221 : vector<8x128xf32>
    %224 = arith.divf %222, %223 : vector<8x128xf32>
    %225 = arith.mulf %216, %195 : vector<8x128xf32>
    %226 = arith.mulf %210, %218 : vector<8x128xf32>
    %227 = arith.addf %225, %226 : vector<8x128xf32>
    %228 = math.tanh %227 : vector<8x128xf32>
    %229 = arith.mulf %224, %228 : vector<8x128xf32>
    %c7_i32 = arith.constant 7 : i32
    %230 = arith.index_cast %c7_i32 : i32 to index
    %c0_48 = arith.constant 0 : index
    %c0_49 = arith.constant 0 : index
    %231 = vector.load %arg2[%230, %c0_48, %c0_49] : memref<8x8x512xbf16, #tpu.memory_space<vmem>>, vector<1x8x512xbf16>
    %232 = vector.shape_cast %231 : vector<1x8x512xbf16> to vector<8x512xbf16>
    %233 = arith.extf %232 : vector<8x512xbf16> to vector<8x512xf32>
    %234 = arith.truncf %229 : vector<8x128xf32> to vector<8x128xbf16>
    %cst_50 = arith.constant dense<0.000000e+00> : vector<8x512xf32>
    %235 = tpu.matmul %234, %3, %cst_50 {dimension_numbers = #tpu.dot_dimension_numbers<[1], [0], [0], [1], [0, 0, 1, 1], [], []>} : vector<8x128xbf16>, vector<128x512xbf16>, vector<8x512xf32> -> vector<8x512xf32>
    %236 = arith.addf %233, %235 : vector<8x512xf32>
    %237 = vector.extract_strided_slice %236 {offsets = [0, 0], sizes = [8, 128], strides = [1, 1]} : vector<8x512xf32> to vector<8x128xf32>
    %238 = arith.negf %237 : vector<8x128xf32>
    %239 = math.exp %238 : vector<8x128xf32>
    %cst_51 = arith.constant 1.000000e+00 : f32
    %240 = vector.broadcast %cst_51 : f32 to vector<8x128xf32>
    %241 = arith.addf %240, %239 : vector<8x128xf32>
    %242 = arith.divf %240, %241 : vector<8x128xf32>
    %243 = vector.extract_strided_slice %236 {offsets = [0, 128], sizes = [8, 128], strides = [1, 1]} : vector<8x512xf32> to vector<8x128xf32>
    %244 = arith.negf %243 : vector<8x128xf32>
    %245 = math.exp %244 : vector<8x128xf32>
    %cst_52 = arith.constant 1.000000e+00 : f32
    %246 = vector.broadcast %cst_52 : f32 to vector<8x128xf32>
    %247 = arith.addf %246, %245 : vector<8x128xf32>
    %248 = arith.divf %246, %247 : vector<8x128xf32>
    %249 = vector.extract_strided_slice %236 {offsets = [0, 256], sizes = [8, 128], strides = [1, 1]} : vector<8x512xf32> to vector<8x128xf32>
    %250 = math.tanh %249 : vector<8x128xf32>
    %251 = vector.extract_strided_slice %236 {offsets = [0, 384], sizes = [8, 128], strides = [1, 1]} : vector<8x512xf32> to vector<8x128xf32>
    %252 = arith.negf %251 : vector<8x128xf32>
    %253 = math.exp %252 : vector<8x128xf32>
    %cst_53 = arith.constant 1.000000e+00 : f32
    %254 = vector.broadcast %cst_53 : f32 to vector<8x128xf32>
    %255 = arith.addf %254, %253 : vector<8x128xf32>
    %256 = arith.divf %254, %255 : vector<8x128xf32>
    %257 = arith.mulf %248, %227 : vector<8x128xf32>
    %258 = arith.mulf %242, %250 : vector<8x128xf32>
    %259 = arith.addf %257, %258 : vector<8x128xf32>
    %260 = math.tanh %259 : vector<8x128xf32>
    %261 = arith.mulf %256, %260 : vector<8x128xf32>
    %c8_i32 = arith.constant 8 : i32
    %c0_54 = arith.constant 0 : index
    %c0_55 = arith.constant 0 : index
    %262 = vector.load %arg5[%c0_54, %c0_55] : memref<8x128xf32, #tpu.memory_space<vmem>>, vector<8x128xf32>
    tpu.vector_store %arg5[%c0_54, %c0_55], %261 {strides = array<i32>} : memref<8x128xf32, #tpu.memory_space<vmem>>, vector<8x128xf32>,
    %c0_56 = arith.constant 0 : index
    %c0_57 = arith.constant 0 : index
    %263 = vector.load %arg6[%c0_56, %c0_57] : memref<8x128xf32, #tpu.memory_space<vmem>>, vector<8x128xf32>
    tpu.vector_store %arg6[%c0_56, %c0_57], %259 {strides = array<i32>} : memref<8x128xf32, #tpu.memory_space<vmem>>, vector<8x128xf32>,
    %c0_i32_58 = arith.constant 0 : i32
    %264 = arith.cmpi eq, %arg1, %c0_i32_58 : i32
    %265 = arith.extui %264 : i1 to i32
    %c0_i32_59 = arith.constant 0 : i32
    %266 = arith.cmpi ne, %265, %c0_i32_59 : i32
    scf.if %266 {
      %c0_60 = arith.constant 0 : index
      %c0_61 = arith.constant 0 : index
      %267 = vector.load %arg5[%c0_60, %c0_61] : memref<8x128xf32, #tpu.memory_space<vmem>>, vector<8x128xf32>
      %c0_62 = arith.constant 0 : index
      %c0_63 = arith.constant 0 : index
      %268 = vector.load %arg4[%c0_62, %c0_63] : memref<8x128xf32, #tpu.memory_space<vmem>>, vector<8x128xf32>
      tpu.vector_store %arg4[%c0_62, %c0_63], %267 {strides = array<i32>} : memref<8x128xf32, #tpu.memory_space<vmem>>, vector<8x128xf32>,
    } else {
    }
    return
  }
  func.func @transform_0(%arg0: i32, %arg1: i32) -> (i32, i32, i32) {
    %c0_i32 = arith.constant 0 : i32
    %c0_i32_0 = arith.constant 0 : i32
    return %arg1, %arg0, %c0_i32 : i32, i32, i32
  }
  func.func @transform_1(%arg0: i32, %arg1: i32) -> (i32, i32) {
    %c0_i32 = arith.constant 0 : i32
    %c0_i32_0 = arith.constant 0 : i32
    %c0_i32_1 = arith.constant 0 : i32
    return %c0_i32, %c0_i32_0 : i32, i32
  }
  func.func @transform_2(%arg0: i32, %arg1: i32) -> (i32, i32) {
    %c0_i32 = arith.constant 0 : i32
    %c0_i32_0 = arith.constant 0 : i32
    return %arg0, %c0_i32 : i32, i32
  }
}

</mosaic_0001>

<bundles_post_ra>
// kernel: net_forward.5
= control target key start
LH: loop header
LB: loop body
LE: loop exit
PB: predicated region body
PF: predicated region fallthrough
CT: control target
= control target key end

     0   :  { %v214_v1 = vmov 0.0   ;;  %vm215_vm0 = vmmov 0   ;;  %s270_s0 = inlined_call_operand.vmem [shape: bf16[8,128], index: 0, kind: input, shape index: {}]   ;;  %s271_s1 = inlined_call_operand.vmem [shape: bf16[128,128], index: 1, kind: input, shape index: {}]   ;;  %s272_s2 = inlined_call_operand.vmem [shape: f32[1,128], index: 2, kind: input, shape index: {}]   ;;  %s273_s3 = inlined_call_operand.hbm [shape: f32[8,128], index: 3, kind: output, shape index: {}]  }
   0x1   :  { %v184_v0 = vld [vmem:[%s271_s1 + $0x38] sm:$0xff]   ;;  %161 = vmatprep.subr.bf16.mxu0 %v214_v1  ;;  %v185_v2 = vld [vmem:[%s271_s1 + $0x30] sm:$0xff]   ;;  %177 = vmatprep.mubr.msk.bf16.mxu0 %vm215_vm0, %v214_v1  ;;  %v186_v3 = vld [vmem:[%s271_s1 + $0x28] sm:$0xff]  }
   0x2   :  { %162 = vmatpush3.bf16.msra.mxu0 %v184_v0 }
   0x3   :  { %163 = vmatprep.subr.bf16.mxu0 %v214_v1 }
   0x6   :  { %164 = vmatpush3.bf16.msra.mxu0 %v185_v2 }
   0x7   :  { %165 = vmatprep.subr.bf16.mxu0 %v214_v1 }
   0x8   :  { %8 = vsyncpa [#allocation3], 0  ;;  %v187_v4 = vld [vmem:[%s271_s1 + $0x20] sm:$0xff]   ;;  %v188_v5 = vld [vmem:[%s271_s1 + $0x18] sm:$0xff]   ;;  %s216_s5 = smov [#allocation2]  }
   0x9   :  { %v189_v6 = vld [vmem:[%s271_s1 + $0x10] sm:$0xff]   ;;  %v190_v7 = vld [vmem:[%s271_s1 + $0x8] sm:$0xff]   ;;  %v191_v8 = vld [vmem:[%s271_s1] sm:$0xff]   ;;  %s135_s6 = sshll.u32 %s216_s5, 4  ;;  %s136_s6 = int_to_ptr.vmem [resolvable:$true] %s135_s6 }
   0xa   :  { %166 = vmatpush3.bf16.msra.mxu0 %v186_v3  ;;  %v16_v9 = vld [vmem:[%s270_s0] sm:$0xf]  ;;  %s192_s1 = scalar_lea.vmem %s136_s6, 128  ;;  %p197_p1 = scmp.lt.s32.totalorder %s136_s6, %s136_s6 }
   0xb   :  { %167 = vmatprep.subr.bf16.mxu0 %v214_v1  ;;  %v143_v10 = vld [vmem:[%s272_s2] ss:$0 sm:$0xff]  ;;  %p193_p0 = scmp.ne.s32.totalorder %s136_s6, %s192_s1  ;;  %p198_p2 = scmp.lt.s32.totalorder %s192_s1, %s192_s1 }
   0xd   :  { %p199_p3 = por %p198_p2, %p197_p1 }
   0xe   :  { %168 = vmatpush3.bf16.msra.mxu0 %v187_v4 }
   0xf   :  { %169 = vmatprep.subr.bf16.mxu0 %v214_v1  ;;  %p200_p4 = pnand %p199_p3, %p193_p0 }
  0x12   :  { %170 = vmatpush3.bf16.msra.mxu0 %v188_v5 }
  0x13   :  { %171 = vmatprep.subr.bf16.mxu0 %v214_v1 }
  0x16   :  { %172 = vmatpush3.bf16.msra.mxu0 %v189_v6 }
  0x17   :  { %173 = vmatprep.subr.bf16.mxu0 %v214_v1 }
  0x1a   :  { %174 = vmatpush3.bf16.msra.mxu0 %v190_v7 }
  0x1b   :  { %175 = vmatprep.subr.bf16.mxu0 %v214_v1 }
  0x1e   :  { %176 = vmatpush3.bf16.msra.mxu0 %v191_v8 }
  0x21   :  { %178 = vmatmul.mubr.bf16.vlgmr.msra.gmra.mxu0 %v16_v9 }
  0xe1   :  { %v122_v11 = vpop.f32.mrf.mxu0 }
  0xe2   :  { %v123_v12 = vadd.f32 %v143_v10, %v122_v11 }
  0xe3   :  { %v179_v13 = vpop.f32.mrf.mxu0 }
  0xe4   :  { %128 = vst [vmem:[#allocation2] sm:$0xff] %v123_v12 }
  0xe5   :  { %v125_v14 = vpop.f32.mrf.mxu0 }
  0xe6   :  { %203 = shalt.err (!%p200_p4)
}
  0xe7   :  { %138 = dma.vmem_to_hbm [thread:$0]  %s136_s6, 128, %s273_s3, [#allocation3]   ;;  %v180_v15 = vpop.f32.mrf.mxu0 }
  0xe8   :  { %212 = dma.done.wait [#allocation3], 128  }
  0xe9   :  { %213 = vsyncadd [#allocation3], 4294967168 }
  0xea   :  { %142 = vsyncpa [#allocation3], 1 }

// kernel: net_forward.3
= control target key start
LH: loop header
LB: loop body
LE: loop exit
PB: predicated region body
PF: predicated region fallthrough
CT: control target
= control target key end

     0   :  { %v457_v1 = vmov 0   ;;  %vm113_vm0 = vcmask 261120   ;;  %v33_v13 = vlaneseq  ;;  %s613_s1 = inlined_call_operand.vmem [shape: bf16[32,512], index: 1, kind: input, shape index: {}]   ;;  %s614_s0 = inlined_call_operand.vmem [shape: bf16[64,32], index: 0, kind: input, shape index: {}]   ;;  %s615_s2 = inlined_call_operand.vmem [shape: f32[1,512], index: 2, kind: input, shape index: {}]   ;;  %s616_s3 = inlined_call_operand.vmem [shape: bf16[64,512], index: 3, kind: output, shape index: {}]  }
   0x1   :  { %v441_v0 = vld [vmem:[%s613_s1 + $0x24] ss:$16 sps:$4 sm:$0xff]   ;;  %158 = vmatprep.mubr.bf16.mxu0 %v457_v1  ;;  %231 = vmatprep.mubr.bf16.mxu1 %v457_v1  ;;  %v443_v2 = vld [vmem:[%s613_s1 + $0x2c] ss:$16 sps:$4 sm:$0xff]   ;;  %v445_v3 = vld [vmem:[%s613_s1 + $0x20] ss:$16 sps:$4 sm:$0xff]  }
   0x2   :  { %138 = vmatprep.subr.bf16.mxu0 %v441_v0  ;;  %v446_v4 = vld [vmem:[%s613_s1 + $0x28] ss:$16 sps:$4 sm:$0xff]   ;;  %211 = vmatprep.subr.bf16.mxu1 %v443_v2  ;;  %v447_v5 = vld [vmem:[%s613_s1 + $0x4] ss:$16 sps:$4 sm:$0xff]   ;;  %v449_v6 = vld [vmem:[%s613_s1 + $0xc] ss:$16 sps:$4 sm:$0xff]  }
   0x3   :  { %139 = vmatpush1.bf16.msra.mxu0 %v445_v3  ;;  %212 = vmatpush1.bf16.msra.mxu1 %v446_v4  ;;  %v451_v7 = vld [vmem:[%s613_s1] ss:$16 sps:$4 sm:$0xff]   ;;  %v452_v8 = vld [vmem:[%s613_s1 + $0x8] ss:$16 sps:$4 sm:$0xff]   ;;  %v34_v14 = vshrl.u32 %v33_v13, 7 }
   0x4   :  { %140 = vmatprep.subr.bf16.mxu0 %v447_v5  ;;  %213 = vmatprep.subr.bf16.mxu1 %v449_v6  ;;  %v453_v9 = vld [vmem:[%s614_s0] sm:$0xff]   ;;  %v454_v10 = vld [vmem:[%s614_s0 + $0x8] sm:$0xff]   ;;  %v455_v11 = vld [vmem:[%s614_s0 + $0x10] sm:$0xff]  }
   0x5   :  { %v456_v12 = vld [vmem:[%s614_s0 + $0x18] sm:$0xff]   ;;  %v35_v15 = vsub.s32 0, %v34_v14  ;;  %v43_v16 = vsub.s32 2, %v34_v14  ;;  %v39_v17 = vsub.s32 1, %v34_v14  ;;  %v47_v18 = vsub.s32 3, %v34_v14 }
   0x6   :  { %v31_v19 = vld [vmem:[%s615_s2] sm:$0xf] }
   0x7   :  { %141 = vmatpush1.bf16.msra.mxu0 %v451_v7  ;;  %214 = vmatpush1.bf16.msra.mxu1 %v452_v8  ;;  %v525_v20 = vrot.slane %v31_v19, %v35_v15  ;;  %v527_v21 = vrot.slane %v31_v19, %v43_v16  ;;  %v529_v22 = vrot.slane %v31_v19, %v39_v17 }
   0x8   :  { %v531_v23 = vrot.slane %v31_v19, %v47_v18 }
   0xa   :  { %400 = vmatmul.mubr.msk.bf16.vlgmr.msra.gmra.mxu0 %vm113_vm0, %v453_v9  ;;  %404 = vmatmul.mubr.msk.bf16.vlgmr.msra.gmra.mxu1 %vm113_vm0, %v453_v9 }
   0xb   :  { %168 = vmatprep.mubr.bf16.mxu0 %v457_v1  ;;  %241 = vmatprep.mubr.bf16.mxu1 %v457_v1 }
  0x12   :  { %401 = vmatmul.mubr.msk.bf16.gmra.mxu0 %vm113_vm0, %v454_v10  ;;  %405 = vmatmul.mubr.msk.bf16.gmra.mxu1 %vm113_vm0, %v454_v10 }
  0x13   :  { %178 = vmatprep.mubr.bf16.mxu0 %v457_v1  ;;  %251 = vmatprep.mubr.bf16.mxu1 %v457_v1 }
  0x1a   :  { %402 = vmatmul.mubr.msk.bf16.gmra.mxu0 %vm113_vm0, %v455_v11  ;;  %406 = vmatmul.mubr.msk.bf16.gmra.mxu1 %vm113_vm0, %v455_v11 }
  0x1b   :  { %188 = vmatprep.mubr.bf16.mxu0 %v457_v1  ;;  %261 = vmatprep.mubr.bf16.mxu1 %v457_v1 }
  0x22   :  { %403 = vmatmul.mubr.msk.bf16.gmra.mxu0 %vm113_vm0, %v456_v12  ;;  %407 = vmatmul.mubr.msk.bf16.gmra.mxu1 %vm113_vm0, %v456_v12 }
  0xca   :  { %v160_v24 = vpop.f32.mrf.mxu0  ;;  %v233_v25 = vpop.f32.mrf.mxu1 }
  0xcb   :  { %v161_v28 = vadd.f32 %v160_v24, %v525_v20  ;;  %v234_v29 = vadd.f32 %v233_v25, %v527_v21 }
  0xcc   :  { %v162_v26 = vpop.f32.mrf.mxu0  ;;  %v235_v27 = vpop.f32.mrf.mxu1 }
  0xcd   :  { %v163_v30 = vadd.f32 %v162_v26, %v529_v22  ;;  %v236_v31 = vadd.f32 %v235_v27, %v531_v23 }
  0xce   :  { %v164_v32 = vpop.f32.mrf.mxu0  ;;  %v237_v33 = vpop.f32.mrf.mxu1 }
  0xcf   :  { %v424_v34 = vpack.c.bf16 %v163_v30, %v161_v28  ;;  %v425_v35 = vpack.c.bf16 %v236_v31, %v234_v29  ;;  %v165_v38 = vadd.f32 %v164_v32, %v525_v20  ;;  %v238_v39 = vadd.f32 %v237_v33, %v527_v21 }
  0xd0   :  { %v166_v36 = vpop.f32.mrf.mxu0  ;;  %v239_v37 = vpop.f32.mrf.mxu1 }
  0xd1   :  { %368 = vst [vmem:[%s616_s3] sm:$0xff] %v424_v34  ;;  %369 = vst [vmem:[%s616_s3 + $0x8] sm:$0xff] %v425_v35  ;;  %v167_v40 = vadd.f32 %v166_v36, %v529_v22  ;;  %v240_v41 = vadd.f32 %v239_v37, %v531_v23 }
  0xd2   :  { %v170_v42 = vpop.f32.mrf.mxu0  ;;  %v243_v43 = vpop.f32.mrf.mxu1 }
  0xd3   :  { %v426_v44 = vpack.c.bf16 %v167_v40, %v165_v38  ;;  %v427_v45 = vpack.c.bf16 %v240_v41, %v238_v39  ;;  %v171_v48 = vadd.f32 %v170_v42, %v525_v20  ;;  %v244_v49 = vadd.f32 %v243_v43, %v527_v21 }
  0xd4   :  { %v172_v46 = vpop.f32.mrf.mxu0  ;;  %v245_v47 = vpop.f32.mrf.mxu1 }
  0xd5   :  { %370 = vst [vmem:[%s616_s3 + $0x10] sm:$0xff] %v426_v44  ;;  %371 = vst [vmem:[%s616_s3 + $0x18] sm:$0xff] %v427_v45  ;;  %v173_v50 = vadd.f32 %v172_v46, %v529_v22  ;;  %v246_v51 = vadd.f32 %v245_v47, %v531_v23 }
  0xd6   :  { %v174_v52 = vpop.f32.mrf.mxu0  ;;  %v247_v53 = vpop.f32.mrf.mxu1 }
  0xd7   :  { %v428_v54 = vpack.c.bf16 %v173_v50, %v171_v48  ;;  %v429_v55 = vpack.c.bf16 %v246_v51, %v244_v49  ;;  %v175_v58 = vadd.f32 %v174_v52, %v525_v20  ;;  %v248_v59 = vadd.f32 %v247_v53, %v527_v21 }
  0xd8   :  { %v176_v56 = vpop.f32.mrf.mxu0  ;;  %v249_v57 = vpop.f32.mrf.mxu1 }
  0xd9   :  { %372 = vst [vmem:[%s616_s3 + $0x20] sm:$0xff] %v428_v54  ;;  %373 = vst [vmem:[%s616_s3 + $0x28] sm:$0xff] %v429_v55  ;;  %v177_v60 = vadd.f32 %v176_v56, %v529_v22  ;;  %v250_v61 = vadd.f32 %v249_v57, %v531_v23 }
  0xda   :  { %v180_v62 = vpop.f32.mrf.mxu0  ;;  %v253_v63 = vpop.f32.mrf.mxu1 }
  0xdb   :  { %v430_v0 = vpack.c.bf16 %v177_v60, %v175_v58  ;;  %v431_v1 = vpack.c.bf16 %v250_v61, %v248_v59  ;;  %v181_v4 = vadd.f32 %v180_v62, %v525_v20  ;;  %v254_v5 = vadd.f32 %v253_v63, %v527_v21 }
  0xdc   :  { %v182_v2 = vpop.f32.mrf.mxu0  ;;  %v255_v3 = vpop.f32.mrf.mxu1 }
  0xdd   :  { %374 = vst [vmem:[%s616_s3 + $0x30] sm:$0xff] %v430_v0  ;;  %375 = vst [vmem:[%s616_s3 + $0x38] sm:$0xff] %v431_v1  ;;  %v183_v6 = vadd.f32 %v182_v2, %v529_v22  ;;  %v256_v7 = vadd.f32 %v255_v3, %v531_v23 }
  0xde   :  { %v184_v8 = vpop.f32.mrf.mxu0  ;;  %v257_v9 = vpop.f32.mrf.mxu1 }
  0xdf   :  { %v432_v10 = vpack.c.bf16 %v183_v6, %v181_v4  ;;  %v433_v11 = vpack.c.bf16 %v256_v7, %v254_v5  ;;  %v185_v14 = vadd.f32 %v184_v8, %v525_v20  ;;  %v258_v15 = vadd.f32 %v257_v9, %v527_v21 }
  0xe0   :  { %v186_v12 = vpop.f32.mrf.mxu0  ;;  %v259_v13 = vpop.f32.mrf.mxu1 }
  0xe1   :  { %376 = vst [vmem:[%s616_s3 + $0x40] sm:$0xff] %v432_v10  ;;  %377 = vst [vmem:[%s616_s3 + $0x48] sm:$0xff] %v433_v11  ;;  %v187_v16 = vadd.f32 %v186_v12, %v529_v22  ;;  %v260_v17 = vadd.f32 %v259_v13, %v531_v23 }
  0xe2   :  { %v190_v18 = vpop.f32.mrf.mxu0  ;;  %v263_v19 = vpop.f32.mrf.mxu1 }
  0xe3   :  { %v434_v24 = vpack.c.bf16 %v187_v16, %v185_v14  ;;  %v435_v25 = vpack.c.bf16 %v260_v17, %v258_v15  ;;  %v191_v28 = vadd.f32 %v190_v18, %v525_v20  ;;  %v264_v29 = vadd.f32 %v263_v19, %v527_v21 }
  0xe4   :  { %v192_v26 = vpop.f32.mrf.mxu0  ;;  %v265_v27 = vpop.f32.mrf.mxu1 }
  0xe5   :  { %378 = vst [vmem:[%s616_s3 + $0x50] sm:$0xff] %v434_v24  ;;  %379 = vst [vmem:[%s616_s3 + $0x58] sm:$0xff] %v435_v25  ;;  %v193_v30 = vadd.f32 %v192_v26, %v529_v22  ;;  %v266_v31 = vadd.f32 %v265_v27, %v531_v23 }
  0xe6   :  { %v194_v32 = vpop.f32.mrf.mxu0  ;;  %v267_v33 = vpop.f32.mrf.mxu1 }
  0xe7   :  { %v436_v34 = vpack.c.bf16 %v193_v30, %v191_v28  ;;  %v437_v35 = vpack.c.bf16 %v266_v31, %v264_v29  ;;  %v195_v38 = vadd.f32 %v194_v32, %v525_v20  ;;  %v268_v39 = vadd.f32 %v267_v33, %v527_v21 }
  0xe8   :  { %v196_v36 = vpop.f32.mrf.mxu0  ;;  %v269_v37 = vpop.f32.mrf.mxu1 }
  0xe9   :  { %380 = vst [vmem:[%s616_s3 + $0x60] sm:$0xff] %v436_v34  ;;  %381 = vst [vmem:[%s616_s3 + $0x68] sm:$0xff] %v437_v35  ;;  %v197_v40 = vadd.f32 %v196_v36, %v529_v22  ;;  %v270_v41 = vadd.f32 %v269_v37, %v531_v23 }
  0xeb   :  { %v438_v42 = vpack.c.bf16 %v197_v40, %v195_v38  ;;  %v439_v43 = vpack.c.bf16 %v270_v41, %v268_v39 }
  0xed   :  { %382 = vst [vmem:[%s616_s3 + $0x70] sm:$0xff] %v438_v42  ;;  %383 = vst [vmem:[%s616_s3 + $0x78] sm:$0xff] %v439_v43 }

// kernel: net_forward.4
= control target key start
LH: loop header
LB: loop body
LE: loop exit
PB: predicated region body
PF: predicated region fallthrough
CT: control target
= control target key end

     0   :  { %v1446_v1 = vmov 0   ;;  %v1447_v33 = vmov 0.0|0.0   ;;  %s2034_s1 = inlined_call_operand.vmem [shape: bf16[128,512], index: 1, kind: input, shape index: {}]   ;;  %s2035_s0 = inlined_call_operand.vmem [shape: bf16[8,8,512], index: 0, kind: input, shape index: {}]   ;;  %s2036_s2 = inlined_call_operand.vmem [shape: f32[8,128], index: 2, kind: output, shape index: {}]  }
   0x1   :  { %v1466_v0 = vld [vmem:[%s2034_s1 + $0xe4] ss:$16 sps:$4 sm:$0xff]   ;;  %251 = vmatprep.mubr.bf16.mxu0 %v1446_v1  ;;  %292 = vmatprep.mubr.bf16.mxu1 %v1446_v1  ;;  %v1473_v2 = vld [vmem:[%s2034_s1 + $0xe0] ss:$16 sps:$4 sm:$0xff]   ;;  %v1496_v6 = vld [vmem:[%s2034_s1 + $0xec] ss:$16 sps:$4 sm:$0xff]  }
   0x2   :  { %219 = vmatprep.subr.bf16.mxu0 %v1466_v0  ;;  %v1479_v3 = vld [vmem:[%s2034_s1 + $0xc4] ss:$16 sps:$4 sm:$0xff]   ;;  %v1485_v4 = vld [vmem:[%s2034_s1 + $0xc0] ss:$16 sps:$4 sm:$0xff]   ;;  %v1501_v7 = vld [vmem:[%s2034_s1 + $0xe8] ss:$16 sps:$4 sm:$0xff]   ;;  %260 = vmatprep.subr.bf16.mxu1 %v1496_v6 }
   0x3   :  { %220 = vmatpush1.bf16.msra.mxu0 %v1473_v2  ;;  %v1491_v5 = vld [vmem:[%s2034_s1 + $0xa4] ss:$16 sps:$4 sm:$0xff]   ;;  %v1507_v8 = vld [vmem:[%s2034_s1 + $0xa0] ss:$16 sps:$4 sm:$0xff]   ;;  %261 = vmatpush1.bf16.msra.mxu1 %v1501_v7  ;;  %v1520_v10 = vld [vmem:[%s2034_s1 + $0xcc] ss:$16 sps:$4 sm:$0xff]  }
   0x4   :  { %221 = vmatprep.subr.bf16.mxu0 %v1479_v3  ;;  %v1514_v9 = vld [vmem:[%s2034_s1 + $0x84] ss:$16 sps:$4 sm:$0xff]   ;;  %v1525_v11 = vld [vmem:[%s2034_s1 + $0xc8] ss:$16 sps:$4 sm:$0xff]   ;;  %262 = vmatprep.subr.bf16.mxu1 %v1520_v10  ;;  %v1532_v12 = vld [vmem:[%s2034_s1 + $0x80] ss:$16 sps:$4 sm:$0xff]  }
   0x5   :  { %v1537_v13 = vld [vmem:[%s2034_s1 + $0x64] ss:$16 sps:$4 sm:$0xff]   ;;  %v1542_v14 = vld [vmem:[%s2034_s1 + $0xac] ss:$16 sps:$4 sm:$0xff]   ;;  %v1549_v15 = vld [vmem:[%s2034_s1 + $0xa8] ss:$16 sps:$4 sm:$0xff]  }
   0x6   :  { %v1555_v16 = vld [vmem:[%s2034_s1 + $0x8c] ss:$16 sps:$4 sm:$0xff]   ;;  %v1561_v17 = vld [vmem:[%s2034_s1 + $0x60] ss:$16 sps:$4 sm:$0xff]   ;;  %v1567_v18 = vld [vmem:[%s2034_s1 + $0x44] ss:$16 sps:$4 sm:$0xff]  }
   0x7   :  { %222 = vmatpush1.bf16.msra.mxu0 %v1485_v4  ;;  %263 = vmatpush1.bf16.msra.mxu1 %v1525_v11  ;;  %v1573_v19 = vld [vmem:[%s2034_s1 + $0x88] ss:$16 sps:$4 sm:$0xff]   ;;  %v1579_v20 = vld [vmem:[%s2034_s1 + $0x6c] ss:$16 sps:$4 sm:$0xff]   ;;  %v1585_v21 = vld [vmem:[%s2034_s1 + $0x40] ss:$16 sps:$4 sm:$0xff]  }
   0x8   :  { %223 = vmatprep.subr.bf16.mxu0 %v1491_v5  ;;  %264 = vmatprep.subr.bf16.mxu1 %v1542_v14  ;;  %v1590_v22 = vld [vmem:[%s2034_s1 + $0x24] ss:$16 sps:$4 sm:$0xff]   ;;  %v1597_v23 = vld [vmem:[%s2034_s1 + $0x68] ss:$16 sps:$4 sm:$0xff]   ;;  %v1603_v24 = vld [vmem:[%s2034_s1 + $0x4c] ss:$16 sps:$4 sm:$0xff]  }
   0x9   :  { %v1609_v25 = vld [vmem:[%s2034_s1 + $0x20] ss:$16 sps:$4 sm:$0xff]   ;;  %v1615_v26 = vld [vmem:[%s2034_s1 + $0x4] ss:$16 sps:$4 sm:$0xff]   ;;  %v1621_v27 = vld [vmem:[%s2034_s1 + $0x48] ss:$16 sps:$4 sm:$0xff]  }
   0xa   :  { %v1627_v28 = vld [vmem:[%s2034_s1 + $0x2c] ss:$16 sps:$4 sm:$0xff]   ;;  %v1633_v29 = vld [vmem:[%s2034_s1] ss:$16 sps:$4 sm:$0xff]   ;;  %v1640_v30 = vld [vmem:[%s2034_s1 + $0x28] ss:$16 sps:$4 sm:$0xff]  }
   0xb   :  { %224 = vmatpush1.bf16.msra.mxu0 %v1507_v8  ;;  %265 = vmatpush1.bf16.msra.mxu1 %v1549_v15  ;;  %v1646_v31 = vld [vmem:[%s2034_s1 + $0xc] ss:$16 sps:$4 sm:$0xff]   ;;  %v1653_v32 = vld [vmem:[%s2034_s1 + $0x8] ss:$16 sps:$4 sm:$0xff]   ;;  %v52_v34 = vld [vmem:[%s2035_s0] sm:$0xff] }
   0xc   :  { %225 = vmatprep.subr.bf16.mxu0 %v1514_v9  ;;  %266 = vmatprep.subr.bf16.mxu1 %v1555_v16  ;;  %v54_v35 = vunpack.c.l.bf16 %v52_v34  ;;  %v55_v36 = vunpack.c.h.bf16 %v52_v34  ;;  %v53_v44 = vld [vmem:[%s2035_s0 + $0x8] sm:$0xff] }
   0xd   :  { %v57_v48 = vunpack.c.h.bf16 %v53_v44  ;;  %v56_v50 = vunpack.c.l.bf16 %v53_v44 }
   0xf   :  { %226 = vmatpush1.bf16.msra.mxu0 %v1532_v12  ;;  %267 = vmatpush1.bf16.msra.mxu1 %v1573_v19 }
  0x10   :  { %227 = vmatprep.subr.bf16.mxu0 %v1537_v13  ;;  %268 = vmatprep.subr.bf16.mxu1 %v1579_v20 }
  0x13   :  { %228 = vmatpush1.bf16.msra.mxu0 %v1561_v17  ;;  %269 = vmatpush1.bf16.msra.mxu1 %v1597_v23 }
  0x14   :  { %229 = vmatprep.subr.bf16.mxu0 %v1567_v18  ;;  %270 = vmatprep.subr.bf16.mxu1 %v1603_v24 }
  0x17   :  { %230 = vmatpush1.bf16.msra.mxu0 %v1585_v21  ;;  %271 = vmatpush1.bf16.msra.mxu1 %v1621_v27 }
  0x18   :  { %231 = vmatprep.subr.bf16.mxu0 %v1590_v22  ;;  %272 = vmatprep.subr.bf16.mxu1 %v1627_v28 }
  0x1b   :  { %232 = vmatpush1.bf16.msra.mxu0 %v1609_v25  ;;  %273 = vmatpush1.bf16.msra.mxu1 %v1640_v30 }
  0x1c   :  { %233 = vmatprep.subr.bf16.mxu0 %v1615_v26  ;;  %274 = vmatprep.subr.bf16.mxu1 %v1646_v31 }
  0x1f   :  { %234 = vmatpush1.bf16.msra.mxu0 %v1633_v29  ;;  %275 = vmatpush1.bf16.msra.mxu1 %v1653_v32 }
  0x20   :  { %337 = vmatprep.subr.bf16.mxu0 %v1466_v0  ;;  %378 = vmatprep.subr.bf16.mxu1 %v1496_v6 }
  0x22   :  { %252 = vmatmul.mubr.bf16.vlgmr.msra.gmra.mxu0 %v1447_v33  ;;  %293 = vmatmul.mubr.bf16.vlgmr.msra.gmra.mxu1 %v1447_v33 }
  0x23   :  { %338 = vmatpush1.bf16.msra.mxu0 %v1473_v2  ;;  %369 = vmatprep.mubr.bf16.mxu0 %v1446_v1 }
  0x24   :  { %339 = vmatprep.subr.bf16.mxu0 %v1479_v3  ;;  %379 = vmatpush1.bf16.msra.mxu1 %v1501_v7 }
  0x25   :  { %380 = vmatprep.subr.bf16.mxu1 %v1520_v10  ;;  %410 = vmatprep.mubr.bf16.mxu1 %v1446_v1 }
  0x27   :  { %340 = vmatpush1.bf16.msra.mxu0 %v1485_v4 }
  0x28   :  { %341 = vmatprep.subr.bf16.mxu0 %v1491_v5  ;;  %381 = vmatpush1.bf16.msra.mxu1 %v1525_v11 }
  0x29   :  { %382 = vmatprep.subr.bf16.mxu1 %v1542_v14 }
  0x2b   :  { %342 = vmatpush1.bf16.msra.mxu0 %v1507_v8 }
  0x2c   :  { %343 = vmatprep.subr.bf16.mxu0 %v1514_v9  ;;  %383 = vmatpush1.bf16.msra.mxu1 %v1549_v15 }
  0x2d   :  { %384 = vmatprep.subr.bf16.mxu1 %v1555_v16 }
  0x2f   :  { %344 = vmatpush1.bf16.msra.mxu0 %v1532_v12 }
  0x30   :  { %345 = vmatprep.subr.bf16.mxu0 %v1537_v13  ;;  %385 = vmatpush1.bf16.msra.mxu1 %v1573_v19 }
  0x31   :  { %386 = vmatprep.subr.bf16.mxu1 %v1579_v20 }
  0x33   :  { %346 = vmatpush1.bf16.msra.mxu0 %v1561_v17 }
  0x34   :  { %347 = vmatprep.subr.bf16.mxu0 %v1567_v18  ;;  %387 = vmatpush1.bf16.msra.mxu1 %v1597_v23 }
  0x35   :  { %388 = vmatprep.subr.bf16.mxu1 %v1603_v24 }
  0x37   :  { %348 = vmatpush1.bf16.msra.mxu0 %v1585_v21 }
  0x38   :  { %349 = vmatprep.subr.bf16.mxu0 %v1590_v22  ;;  %389 = vmatpush1.bf16.msra.mxu1 %v1621_v27 }
  0x39   :  { %390 = vmatprep.subr.bf16.mxu1 %v1627_v28 }
  0x3b   :  { %350 = vmatpush1.bf16.msra.mxu0 %v1609_v25 }
  0x3c   :  { %351 = vmatprep.subr.bf16.mxu0 %v1615_v26  ;;  %391 = vmatpush1.bf16.msra.mxu1 %v1640_v30 }
  0x3d   :  { %392 = vmatprep.subr.bf16.mxu1 %v1646_v31 }
  0x3f   :  { %352 = vmatpush1.bf16.msra.mxu0 %v1633_v29 }
  0x40   :  { %455 = vmatprep.subr.bf16.mxu0 %v1466_v0  ;;  %393 = vmatpush1.bf16.msra.mxu1 %v1653_v32 }
  0x41   :  { %496 = vmatprep.subr.bf16.mxu1 %v1496_v6 }
  0xe2   :  { %v253_v37 = vpop.f32.mrf.mxu0  ;;  %v294_v45 = vpop.f32.mrf.mxu1 }
  0xe3   :  { %v301_v38 = vadd.f32 %v253_v37, %v54_v35  ;;  %v303_v53 = vadd.f32 %v294_v45, %v56_v50 }
  0xe4   :  { %v255_v39 = vpop.f32.mrf.mxu0  ;;  %v296_v47 = vpop.f32.mrf.mxu1 }
  0xe5   :  { %v1198_v40 = vmul.f32 -1.442695, %v301_v38  ;;  %v302_v41 = vadd.f32 %v255_v39, %v55_v36  ;;  %v304_v52 = vadd.f32 %v296_v47, %v57_v48 }
  0xe6   :  { %v257_v42 = vpop.f32.mrf.mxu0  ;;  %v298_v49 = vpop.f32.mrf.mxu1 }
  0xe7   :  { %1286 = vpow2.f32 %v1198_v40  ;;  %v1199_v43 = vmul.f32 -1.442695, %v302_v41  ;;  %v1200_v54 = vmul.f32 -1.442695, %v304_v52  ;;  %v1201_v40 = vld [vmem:[%s2035_s0 + $0x10] sm:$0xff] }
  0xe8   :  { %v258_v46 = vpop.f32.mrf.mxu0  ;;  %v299_v51 = vpop.f32.mrf.mxu1  ;;  %v332_v41 = vunpack.c.l.bf16 %v1201_v40  ;;  %v333_v42 = vunpack.c.h.bf16 %v1201_v40 }
  0xe9   :  { %1288 = vpow2.f32 %v1199_v43 }
  0xea   :  { %1290 = vtanh.f32 %v303_v53 }
  0xeb   :  { %1292 = vpow2.f32 %v1200_v54 }
  0xf4   :  { %v1287_v55 = vpop.eup %1286 }
  0xf5   :  { %v308_v56 = vadd.f32 1.0, %v1287_v55  ;;  %v1202_v55 = vld [vmem:[%s2035_s0 + $0x18] sm:$0xff] }
  0xf6   :  { %v1289_v57 = vpop.eup %1288 }
  0xf7   :  { %1294 = vrcp.f32 %v308_v56  ;;  %v314_v58 = vadd.f32 1.0, %v1289_v57  ;;  %v1291_v59 = vpop.eup %1290  ;;  %v335_v56 = vunpack.c.h.bf16 %v1202_v55 }
  0xf8   :  { %v1293_v60 = vpop.eup %1292 }
  0xf9   :  { %1296 = vrcp.f32 %v314_v58  ;;  %v321_v63 = vadd.f32 1.0, %v1293_v60  ;;  %v334_v58 = vunpack.c.l.bf16 %v1202_v55 }
  0xfb   :  { %1298 = vrcp.f32 %v321_v63 }
 0x104   :  { %v1295_v61 = vpop.eup %1294 }
 0x105   :  { %v325_v34 = vmul.f32 %v1295_v61, %v1291_v59 }
 0x106   :  { %v1297_v62 = vpop.eup %1296 }
 0x107   :  { %v324_v33 = vmul.f32 0.0, %v1297_v62 }
 0x108   :  { %v1299_v36 = vpop.eup %1298 }
 0x109   :  { %v1699_v35 = vadd.f32 %v325_v34, %v324_v33 }
 0x10b   :  { %1300 = vtanh.f32 %v1699_v35 }
 0x118   :  { %v1301_v37 = vpop.eup %1300 }
 0x119   :  { %v328_v38 = vmul.f32 %v1301_v37, %v1299_v36 }
 0x11b   :  { %v336_v39 = vpack.c.bf16 %v328_v38, %v328_v38 }
 0x11d   :  { %370 = vmatmul.mubr.bf16.vlgmr.msra.gmra.mxu0 %v336_v39  ;;  %411 = vmatmul.mubr.bf16.vlgmr.msra.gmra.mxu1 %v336_v39 }
 0x11e   :  { %456 = vmatpush1.bf16.msra.mxu0 %v1473_v2  ;;  %497 = vmatpush1.bf16.msra.mxu1 %v1501_v7 }
 0x11f   :  { %457 = vmatprep.subr.bf16.mxu0 %v1479_v3  ;;  %498 = vmatprep.subr.bf16.mxu1 %v1520_v10 }
 0x120   :  { %487 = vmatprep.mubr.bf16.mxu0 %v1446_v1  ;;  %528 = vmatprep.mubr.bf16.mxu1 %v1446_v1 }
 0x122   :  { %458 = vmatpush1.bf16.msra.mxu0 %v1485_v4  ;;  %499 = vmatpush1.bf16.msra.mxu1 %v1525_v11 }
 0x123   :  { %459 = vmatprep.subr.bf16.mxu0 %v1491_v5  ;;  %500 = vmatprep.subr.bf16.mxu1 %v1542_v14 }
 0x126   :  { %460 = vmatpush1.bf16.msra.mxu0 %v1507_v8  ;;  %501 = vmatpush1.bf16.msra.mxu1 %v1549_v15 }
 0x127   :  { %461 = vmatprep.subr.bf16.mxu0 %v1514_v9  ;;  %502 = vmatprep.subr.bf16.mxu1 %v1555_v16 }
 0x12a   :  { %462 = vmatpush1.bf16.msra.mxu0 %v1532_v12  ;;  %503 = vmatpush1.bf16.msra.mxu1 %v1573_v19 }
 0x12b   :  { %463 = vmatprep.subr.bf16.mxu0 %v1537_v13  ;;  %504 = vmatprep.subr.bf16.mxu1 %v1579_v20 }
 0x12e   :  { %464 = vmatpush1.bf16.msra.mxu0 %v1561_v17  ;;  %505 = vmatpush1.bf16.msra.mxu1 %v1597_v23 }
 0x12f   :  { %465 = vmatprep.subr.bf16.mxu0 %v1567_v18  ;;  %506 = vmatprep.subr.bf16.mxu1 %v1603_v24 }
 0x132   :  { %466 = vmatpush1.bf16.msra.mxu0 %v1585_v21  ;;  %507 = vmatpush1.bf16.msra.mxu1 %v1621_v27 }
 0x133   :  { %467 = vmatprep.subr.bf16.mxu0 %v1590_v22  ;;  %508 = vmatprep.subr.bf16.mxu1 %v1627_v28 }
 0x136   :  { %468 = vmatpush1.bf16.msra.mxu0 %v1609_v25  ;;  %509 = vmatpush1.bf16.msra.mxu1 %v1640_v30 }
 0x137   :  { %469 = vmatprep.subr.bf16.mxu0 %v1615_v26  ;;  %510 = vmatprep.subr.bf16.mxu1 %v1646_v31 }
 0x13a   :  { %470 = vmatpush1.bf16.msra.mxu0 %v1633_v29  ;;  %511 = vmatpush1.bf16.msra.mxu1 %v1653_v32 }
 0x13b   :  { %573 = vmatprep.subr.bf16.mxu0 %v1466_v0  ;;  %614 = vmatprep.subr.bf16.mxu1 %v1496_v6 }
 0x1dd   :  { %v371_v43 = vpop.f32.mrf.mxu0  ;;  %v412_v44 = vpop.f32.mrf.mxu1 }
 0x1de   :  { %v419_v45 = vadd.f32 %v371_v43, %v332_v41  ;;  %v421_v61 = vadd.f32 %v412_v44, %v334_v58 }
 0x1df   :  { %v373_v46 = vpop.f32.mrf.mxu0  ;;  %v414_v47 = vpop.f32.mrf.mxu1 }
 0x1e0   :  { %v1203_v48 = vmul.f32 -1.442695, %v419_v45  ;;  %v420_v49 = vadd.f32 %v373_v46, %v333_v42  ;;  %v422_v57 = vadd.f32 %v414_v47, %v335_v56 }
 0x1e1   :  { %v375_v50 = vpop.f32.mrf.mxu0  ;;  %v416_v51 = vpop.f32.mrf.mxu1 }
 0x1e2   :  { %1302 = vpow2.f32 %v1203_v48  ;;  %v1204_v52 = vmul.f32 -1.442695, %v420_v49  ;;  %v1205_v59 = vmul.f32 -1.442695, %v422_v57 }
 0x1e3   :  { %v376_v53 = vpop.f32.mrf.mxu0  ;;  %v417_v54 = vpop.f32.mrf.mxu1 }
 0x1e4   :  { %1304 = vpow2.f32 %v1204_v52 }
 0x1e5   :  { %1306 = vpow2.f32 %v1205_v59 }
 0x1ef   :  { %v1303_v60 = vpop.eup %1302 }
 0x1f0   :  { %v426_v62 = vadd.f32 1.0, %v1303_v60 }
 0x1f1   :  { %v1305_v63 = vpop.eup %1304 }
 0x1f2   :  { %1308 = vrcp.f32 %v426_v62  ;;  %v432_v33 = vadd.f32 1.0, %v1305_v63  ;;  %v1307_v34 = vpop.eup %1306 }
 0x1f3   :  { %1310 = vtanh.f32 %v421_v61  ;;  %v439_v39 = vadd.f32 1.0, %v1307_v34  ;;  %v1207_v61 = vld [vmem:[%s2035_s0 + $0x28] sm:$0xff] }
 0x1f4   :  { %1312 = vrcp.f32 %v432_v33  ;;  %v453_v62 = vunpack.c.h.bf16 %v1207_v61  ;;  %v452_v33 = vunpack.c.l.bf16 %v1207_v61 }
 0x1f5   :  { %1314 = vrcp.f32 %v439_v39 }
 0x1ff   :  { %v1309_v36 = vpop.eup %1308 }
 0x200   :  { %v1311_v37 = vpop.eup %1310 }
 0x201   :  { %v1313_v38 = vpop.eup %1312  ;;  %v443_v40 = vmul.f32 %v1311_v37, %v1309_v36 }
 0x202   :  { %v442_v41 = vmul.f32 %v1313_v38, %v1699_v35  ;;  %v1315_v43 = vpop.eup %1314  ;;  %v1206_v35 = vld [vmem:[%s2035_s0 + $0x20] sm:$0xff] }
 0x203   :  { %v450_v47 = vunpack.c.l.bf16 %v1206_v35  ;;  %v451_v48 = vunpack.c.h.bf16 %v1206_v35 }
 0x204   :  { %v1743_v42 = vadd.f32 %v443_v40, %v442_v41 }
 0x206   :  { %1316 = vtanh.f32 %v1743_v42 }
 0x213   :  { %v1317_v44 = vpop.eup %1316 }
 0x214   :  { %v446_v45 = vmul.f32 %v1317_v44, %v1315_v43 }
 0x216   :  { %v454_v46 = vpack.c.bf16 %v446_v45, %v446_v45 }
 0x218   :  { %488 = vmatmul.mubr.bf16.vlgmr.msra.gmra.mxu0 %v454_v46  ;;  %529 = vmatmul.mubr.bf16.vlgmr.msra.gmra.mxu1 %v454_v46 }
 0x219   :  { %574 = vmatpush1.bf16.msra.mxu0 %v1473_v2  ;;  %615 = vmatpush1.bf16.msra.mxu1 %v1501_v7 }
 0x21a   :  { %575 = vmatprep.subr.bf16.mxu0 %v1479_v3  ;;  %616 = vmatprep.subr.bf16.mxu1 %v1520_v10 }
 0x21b   :  { %605 = vmatprep.mubr.bf16.mxu0 %v1446_v1  ;;  %646 = vmatprep.mubr.bf16.mxu1 %v1446_v1 }
 0x21d   :  { %576 = vmatpush1.bf16.msra.mxu0 %v1485_v4  ;;  %617 = vmatpush1.bf16.msra.mxu1 %v1525_v11 }
 0x21e   :  { %577 = vmatprep.subr.bf16.mxu0 %v1491_v5  ;;  %618 = vmatprep.subr.bf16.mxu1 %v1542_v14 }
 0x221   :  { %578 = vmatpush1.bf16.msra.mxu0 %v1507_v8  ;;  %619 = vmatpush1.bf16.msra.mxu1 %v1549_v15 }
 0x222   :  { %579 = vmatprep.subr.bf16.mxu0 %v1514_v9  ;;  %620 = vmatprep.subr.bf16.mxu1 %v1555_v16 }
 0x225   :  { %580 = vmatpush1.bf16.msra.mxu0 %v1532_v12  ;;  %621 = vmatpush1.bf16.msra.mxu1 %v1573_v19 }
 0x226   :  { %581 = vmatprep.subr.bf16.mxu0 %v1537_v13  ;;  %622 = vmatprep.subr.bf16.mxu1 %v1579_v20 }
 0x229   :  { %582 = vmatpush1.bf16.msra.mxu0 %v1561_v17  ;;  %623 = vmatpush1.bf16.msra.mxu1 %v1597_v23 }
 0x22a   :  { %583 = vmatprep.subr.bf16.mxu0 %v1567_v18  ;;  %624 = vmatprep.subr.bf16.mxu1 %v1603_v24 }
 0x22d   :  { %584 = vmatpush1.bf16.msra.mxu0 %v1585_v21  ;;  %625 = vmatpush1.bf16.msra.mxu1 %v1621_v27 }
 0x22e   :  { %585 = vmatprep.subr.bf16.mxu0 %v1590_v22  ;;  %626 = vmatprep.subr.bf16.mxu1 %v1627_v28 }
 0x231   :  { %586 = vmatpush1.bf16.msra.mxu0 %v1609_v25  ;;  %627 = vmatpush1.bf16.msra.mxu1 %v1640_v30 }
 0x232   :  { %587 = vmatprep.subr.bf16.mxu0 %v1615_v26  ;;  %628 = vmatprep.subr.bf16.mxu1 %v1646_v31 }
 0x235   :  { %588 = vmatpush1.bf16.msra.mxu0 %v1633_v29  ;;  %629 = vmatpush1.bf16.msra.mxu1 %v1653_v32 }
 0x236   :  { %691 = vmatprep.subr.bf16.mxu0 %v1466_v0  ;;  %732 = vmatprep.subr.bf16.mxu1 %v1496_v6 }
 0x2d8   :  { %v489_v49 = vpop.f32.mrf.mxu0  ;;  %v530_v50 = vpop.f32.mrf.mxu1 }
 0x2d9   :  { %v537_v51 = vadd.f32 %v489_v49, %v450_v47  ;;  %v539_v37 = vadd.f32 %v530_v50, %v452_v33 }
 0x2da   :  { %v491_v52 = vpop.f32.mrf.mxu0  ;;  %v532_v53 = vpop.f32.mrf.mxu1 }
 0x2db   :  { %v1208_v54 = vmul.f32 -1.442695, %v537_v51  ;;  %v538_v55 = vadd.f32 %v491_v52, %v451_v48  ;;  %v540_v63 = vadd.f32 %v532_v53, %v453_v62 }
 0x2dc   :  { %v493_v56 = vpop.f32.mrf.mxu0  ;;  %v534_v57 = vpop.f32.mrf.mxu1 }
 0x2dd   :  { %1318 = vpow2.f32 %v1208_v54  ;;  %v1209_v58 = vmul.f32 -1.442695, %v538_v55  ;;  %v1210_v34 = vmul.f32 -1.442695, %v540_v63 }
 0x2de   :  { %v494_v59 = vpop.f32.mrf.mxu0  ;;  %v535_v60 = vpop.f32.mrf.mxu1 }
 0x2df   :  { %1320 = vpow2.f32 %v1209_v58 }
 0x2e0   :  { %1322 = vpow2.f32 %v1210_v34 }
 0x2ea   :  { %v1319_v36 = vpop.eup %1318 }
 0x2eb   :  { %v544_v38 = vadd.f32 1.0, %v1319_v36 }
 0x2ec   :  { %v1321_v39 = vpop.eup %1320 }
 0x2ed   :  { %1324 = vrcp.f32 %v544_v38  ;;  %v550_v40 = vadd.f32 1.0, %v1321_v39  ;;  %v1323_v41 = vpop.eup %1322 }
 0x2ee   :  { %1326 = vtanh.f32 %v539_v37  ;;  %v557_v46 = vadd.f32 1.0, %v1323_v41  ;;  %v1212_v37 = vld [vmem:[%s2035_s0 + $0x38] sm:$0xff] }
 0x2ef   :  { %1328 = vrcp.f32 %v550_v40  ;;  %v571_v38 = vunpack.c.h.bf16 %v1212_v37  ;;  %v570_v40 = vunpack.c.l.bf16 %v1212_v37 }
 0x2f0   :  { %1330 = vrcp.f32 %v557_v46 }
 0x2fa   :  { %v1325_v43 = vpop.eup %1324 }
 0x2fb   :  { %v1327_v44 = vpop.eup %1326 }
 0x2fc   :  { %v1329_v45 = vpop.eup %1328  ;;  %v561_v35 = vmul.f32 %v1327_v44, %v1325_v43 }
 0x2fd   :  { %v560_v47 = vmul.f32 %v1329_v45, %v1743_v42  ;;  %v1331_v49 = vpop.eup %1330  ;;  %v1211_v42 = vld [vmem:[%s2035_s0 + $0x30] sm:$0xff] }
 0x2fe   :  { %v568_v53 = vunpack.c.l.bf16 %v1211_v42  ;;  %v569_v54 = vunpack.c.h.bf16 %v1211_v42 }
 0x2ff   :  { %v1787_v48 = vadd.f32 %v561_v35, %v560_v47 }
 0x301   :  { %1332 = vtanh.f32 %v1787_v48 }
 0x30e   :  { %v1333_v50 = vpop.eup %1332 }
 0x30f   :  { %v564_v51 = vmul.f32 %v1333_v50, %v1331_v49 }
 0x311   :  { %v572_v52 = vpack.c.bf16 %v564_v51, %v564_v51 }
 0x313   :  { %606 = vmatmul.mubr.bf16.vlgmr.msra.gmra.mxu0 %v572_v52  ;;  %647 = vmatmul.mubr.bf16.vlgmr.msra.gmra.mxu1 %v572_v52 }
 0x314   :  { %692 = vmatpush1.bf16.msra.mxu0 %v1473_v2  ;;  %733 = vmatpush1.bf16.msra.mxu1 %v1501_v7 }
 0x315   :  { %693 = vmatprep.subr.bf16.mxu0 %v1479_v3  ;;  %734 = vmatprep.subr.bf16.mxu1 %v1520_v10 }
 0x316   :  { %723 = vmatprep.mubr.bf16.mxu0 %v1446_v1  ;;  %764 = vmatprep.mubr.bf16.mxu1 %v1446_v1 }
 0x318   :  { %694 = vmatpush1.bf16.msra.mxu0 %v1485_v4  ;;  %735 = vmatpush1.bf16.msra.mxu1 %v1525_v11 }
 0x319   :  { %695 = vmatprep.subr.bf16.mxu0 %v1491_v5  ;;  %736 = vmatprep.subr.bf16.mxu1 %v1542_v14 }
 0x31c   :  { %696 = vmatpush1.bf16.msra.mxu0 %v1507_v8  ;;  %737 = vmatpush1.bf16.msra.mxu1 %v1549_v15 }
 0x31d   :  { %697 = vmatprep.subr.bf16.mxu0 %v1514_v9  ;;  %738 = vmatprep.subr.bf16.mxu1 %v1555_v16 }
 0x320   :  { %698 = vmatpush1.bf16.msra.mxu0 %v1532_v12  ;;  %739 = vmatpush1.bf16.msra.mxu1 %v1573_v19 }
 0x321   :  { %699 = vmatprep.subr.bf16.mxu0 %v1537_v13  ;;  %740 = vmatprep.subr.bf16.mxu1 %v1579_v20 }
 0x324   :  { %700 = vmatpush1.bf16.msra.mxu0 %v1561_v17  ;;  %741 = vmatpush1.bf16.msra.mxu1 %v1597_v23 }
 0x325   :  { %701 = vmatprep.subr.bf16.mxu0 %v1567_v18  ;;  %742 = vmatprep.subr.bf16.mxu1 %v1603_v24 }
 0x328   :  { %702 = vmatpush1.bf16.msra.mxu0 %v1585_v21  ;;  %743 = vmatpush1.bf16.msra.mxu1 %v1621_v27 }
 0x329   :  { %703 = vmatprep.subr.bf16.mxu0 %v1590_v22  ;;  %744 = vmatprep.subr.bf16.mxu1 %v1627_v28 }
 0x32c   :  { %704 = vmatpush1.bf16.msra.mxu0 %v1609_v25  ;;  %745 = vmatpush1.bf16.msra.mxu1 %v1640_v30 }
 0x32d   :  { %705 = vmatprep.subr.bf16.mxu0 %v1615_v26  ;;  %746 = vmatprep.subr.bf16.mxu1 %v1646_v31 }
 0x330   :  { %706 = vmatpush1.bf16.msra.mxu0 %v1633_v29  ;;  %747 = vmatpush1.bf16.msra.mxu1 %v1653_v32 }
 0x331   :  { %809 = vmatprep.subr.bf16.mxu0 %v1466_v0  ;;  %850 = vmatprep.subr.bf16.mxu1 %v1496_v6 }
 0x3d3   :  { %v607_v55 = vpop.f32.mrf.mxu0  ;;  %v648_v56 = vpop.f32.mrf.mxu1 }
 0x3d4   :  { %v655_v57 = vadd.f32 %v607_v55, %v568_v53  ;;  %v657_v44 = vadd.f32 %v648_v56, %v570_v40 }
 0x3d5   :  { %v609_v58 = vpop.f32.mrf.mxu0  ;;  %v650_v59 = vpop.f32.mrf.mxu1 }
 0x3d6   :  { %v1213_v60 = vmul.f32 -1.442695, %v655_v57  ;;  %v656_v61 = vadd.f32 %v609_v58, %v569_v54  ;;  %v658_v39 = vadd.f32 %v650_v59, %v571_v38 }
 0x3d7   :  { %v611_v62 = vpop.f32.mrf.mxu0  ;;  %v652_v63 = vpop.f32.mrf.mxu1 }
 0x3d8   :  { %1334 = vpow2.f32 %v1213_v60  ;;  %v1214_v33 = vmul.f32 -1.442695, %v656_v61  ;;  %v1215_v41 = vmul.f32 -1.442695, %v658_v39 }
 0x3d9   :  { %v612_v34 = vpop.f32.mrf.mxu0  ;;  %v653_v36 = vpop.f32.mrf.mxu1 }
 0x3da   :  { %1336 = vpow2.f32 %v1214_v33 }
 0x3db   :  { %1338 = vpow2.f32 %v1215_v41 }
 0x3e5   :  { %v1335_v43 = vpop.eup %1334 }
 0x3e6   :  { %v662_v45 = vadd.f32 1.0, %v1335_v43 }
 0x3e7   :  { %v1337_v46 = vpop.eup %1336 }
 0x3e8   :  { %1340 = vrcp.f32 %v662_v45  ;;  %v668_v35 = vadd.f32 1.0, %v1337_v46  ;;  %v1339_v47 = vpop.eup %1338 }
 0x3e9   :  { %1342 = vtanh.f32 %v657_v44  ;;  %v675_v52 = vadd.f32 1.0, %v1339_v47 }
 0x3ea   :  { %1344 = vrcp.f32 %v668_v35 }
 0x3eb   :  { %1346 = vrcp.f32 %v675_v52 }
 0x3f5   :  { %v1341_v49 = vpop.eup %1340 }
 0x3f6   :  { %v1343_v50 = vpop.eup %1342 }
 0x3f7   :  { %v1345_v51 = vpop.eup %1344  ;;  %v679_v42 = vmul.f32 %v1343_v50, %v1341_v49 }
 0x3f8   :  { %v678_v53 = vmul.f32 %v1345_v51, %v1787_v48  ;;  %v1347_v55 = vpop.eup %1346  ;;  %v1216_v48 = vld [vmem:[%s2035_s0 + $0x40] sm:$0xff] }
 0x3f9   :  { %v686_v59 = vunpack.c.l.bf16 %v1216_v48  ;;  %v687_v60 = vunpack.c.h.bf16 %v1216_v48 }
 0x3fa   :  { %v1831_v54 = vadd.f32 %v679_v42, %v678_v53 }
 0x3fc   :  { %1348 = vtanh.f32 %v1831_v54 }
 0x409   :  { %v1349_v56 = vpop.eup %1348 }
 0x40a   :  { %v682_v57 = vmul.f32 %v1349_v56, %v1347_v55 }
 0x40c   :  { %v690_v58 = vpack.c.bf16 %v682_v57, %v682_v57 }
 0x40e   :  { %724 = vmatmul.mubr.bf16.vlgmr.msra.gmra.mxu0 %v690_v58  ;;  %765 = vmatmul.mubr.bf16.vlgmr.msra.gmra.mxu1 %v690_v58 }
 0x40f   :  { %810 = vmatpush1.bf16.msra.mxu0 %v1473_v2  ;;  %851 = vmatpush1.bf16.msra.mxu1 %v1501_v7 }
 0x410   :  { %811 = vmatprep.subr.bf16.mxu0 %v1479_v3  ;;  %852 = vmatprep.subr.bf16.mxu1 %v1520_v10 }
 0x411   :  { %841 = vmatprep.mubr.bf16.mxu0 %v1446_v1  ;;  %882 = vmatprep.mubr.bf16.mxu1 %v1446_v1 }
 0x413   :  { %812 = vmatpush1.bf16.msra.mxu0 %v1485_v4  ;;  %853 = vmatpush1.bf16.msra.mxu1 %v1525_v11 }
 0x414   :  { %813 = vmatprep.subr.bf16.mxu0 %v1491_v5  ;;  %854 = vmatprep.subr.bf16.mxu1 %v1542_v14 }
 0x417   :  { %814 = vmatpush1.bf16.msra.mxu0 %v1507_v8  ;;  %855 = vmatpush1.bf16.msra.mxu1 %v1549_v15 }
 0x418   :  { %815 = vmatprep.subr.bf16.mxu0 %v1514_v9  ;;  %856 = vmatprep.subr.bf16.mxu1 %v1555_v16 }
 0x41b   :  { %816 = vmatpush1.bf16.msra.mxu0 %v1532_v12  ;;  %857 = vmatpush1.bf16.msra.mxu1 %v1573_v19 }
 0x41c   :  { %817 = vmatprep.subr.bf16.mxu0 %v1537_v13  ;;  %858 = vmatprep.subr.bf16.mxu1 %v1579_v20 }
 0x41f   :  { %818 = vmatpush1.bf16.msra.mxu0 %v1561_v17  ;;  %859 = vmatpush1.bf16.msra.mxu1 %v1597_v23 }
 0x420   :  { %819 = vmatprep.subr.bf16.mxu0 %v1567_v18  ;;  %860 = vmatprep.subr.bf16.mxu1 %v1603_v24 }
 0x423   :  { %820 = vmatpush1.bf16.msra.mxu0 %v1585_v21  ;;  %861 = vmatpush1.bf16.msra.mxu1 %v1621_v27 }
 0x424   :  { %821 = vmatprep.subr.bf16.mxu0 %v1590_v22  ;;  %862 = vmatprep.subr.bf16.mxu1 %v1627_v28 }
 0x427   :  { %822 = vmatpush1.bf16.msra.mxu0 %v1609_v25  ;;  %863 = vmatpush1.bf16.msra.mxu1 %v1640_v30 }
 0x428   :  { %823 = vmatprep.subr.bf16.mxu0 %v1615_v26  ;;  %864 = vmatprep.subr.bf16.mxu1 %v1646_v31 }
 0x42b   :  { %824 = vmatpush1.bf16.msra.mxu0 %v1633_v29  ;;  %865 = vmatpush1.bf16.msra.mxu1 %v1653_v32 }
 0x42c   :  { %927 = vmatprep.subr.bf16.mxu0 %v1466_v0  ;;  %968 = vmatprep.subr.bf16.mxu1 %v1496_v6  ;;  %v1217_v6 = vld [vmem:[%s2035_s0 + $0x48] sm:$0xff] }
 0x42d   :  { %v689_v43 = vunpack.c.h.bf16 %v1217_v6  ;;  %v688_v45 = vunpack.c.l.bf16 %v1217_v6  ;;  %v1418_v6 = vld [vmem:[%s2034_s1 + $0xc4] ss:$16 sps:$4 sm:$0xff]  }
 0x4ce   :  { %v725_v61 = vpop.f32.mrf.mxu0  ;;  %v766_v62 = vpop.f32.mrf.mxu1 }
 0x4cf   :  { %v773_v63 = vadd.f32 %v725_v61, %v686_v59  ;;  %v775_v47 = vadd.f32 %v766_v62, %v688_v45  ;;  %v1421_v45 = vld [vmem:[%s2034_s1 + $0xc8] ss:$16 sps:$4 sm:$0xff]  }
 0x4d0   :  { %v727_v33 = vpop.f32.mrf.mxu0  ;;  %v768_v34 = vpop.f32.mrf.mxu1 }
 0x4d1   :  { %v1218_v36 = vmul.f32 -1.442695, %v773_v63  ;;  %v774_v37 = vadd.f32 %v727_v33, %v687_v60  ;;  %v776_v44 = vadd.f32 %v768_v34, %v689_v43  ;;  %v1419_v43 = vld [vmem:[%s2034_s1 + $0xcc] ss:$16 sps:$4 sm:$0xff]  }
 0x4d2   :  { %v729_v38 = vpop.f32.mrf.mxu0  ;;  %v770_v39 = vpop.f32.mrf.mxu1 }
 0x4d3   :  { %1350 = vpow2.f32 %v1218_v36  ;;  %v1219_v40 = vmul.f32 -1.442695, %v774_v37  ;;  %v1220_v46 = vmul.f32 -1.442695, %v776_v44  ;;  %v1420_v44 = vld [vmem:[%s2034_s1 + $0xc0] ss:$16 sps:$4 sm:$0xff]  }
 0x4d4   :  { %v730_v0 = vpop.f32.mrf.mxu0  ;;  %v771_v41 = vpop.f32.mrf.mxu1 }
 0x4d5   :  { %1352 = vpow2.f32 %v1219_v40  ;;  %v1416_v0 = vld [vmem:[%s2034_s1 + $0xe0] ss:$16 sps:$4 sm:$0xff]   ;;  %v1417_v41 = vld [vmem:[%s2034_s1 + $0xe8] ss:$16 sps:$4 sm:$0xff]  }
 0x4d6   :  { %1354 = vpow2.f32 %v1220_v46  ;;  %v1422_v46 = vld [vmem:[%s2034_s1 + $0xa4] ss:$16 sps:$4 sm:$0xff]  }
 0x4e0   :  { %v1351_v35 = vpop.eup %1350 }
 0x4e1   :  { %v780_v49 = vadd.f32 1.0, %v1351_v35  ;;  %v1423_v35 = vld [vmem:[%s2034_s1 + $0xac] ss:$16 sps:$4 sm:$0xff]  }
 0x4e2   :  { %v1353_v50 = vpop.eup %1352 }
 0x4e3   :  { %1356 = vrcp.f32 %v780_v49  ;;  %v786_v51 = vadd.f32 1.0, %v1353_v50  ;;  %v1355_v52 = vpop.eup %1354  ;;  %v1426_v49 = vld [vmem:[%s2034_s1 + $0x84] ss:$16 sps:$4 sm:$0xff]   ;;  %v1427_v50 = vld [vmem:[%s2034_s1 + $0x8c] ss:$16 sps:$4 sm:$0xff]  }
 0x4e4   :  { %1358 = vtanh.f32 %v775_v47  ;;  %v793_v56 = vadd.f32 1.0, %v1355_v52  ;;  %v1425_v47 = vld [vmem:[%s2034_s1 + $0xa8] ss:$16 sps:$4 sm:$0xff]  }
 0x4e5   :  { %1360 = vrcp.f32 %v786_v51  ;;  %v1428_v51 = vld [vmem:[%s2034_s1 + $0x80] ss:$16 sps:$4 sm:$0xff]   ;;  %v1429_v52 = vld [vmem:[%s2034_s1 + $0x88] ss:$16 sps:$4 sm:$0xff]  }
 0x4e6   :  { %1362 = vrcp.f32 %v793_v56  ;;  %v1433_v56 = vld [vmem:[%s2034_s1 + $0x68] ss:$16 sps:$4 sm:$0xff]  }
 0x4f0   :  { %v1357_v42 = vpop.eup %1356 }
 0x4f1   :  { %v1359_v53 = vpop.eup %1358 }
 0x4f2   :  { %v1361_v55 = vpop.eup %1360  ;;  %v797_v57 = vmul.f32 %v1359_v53, %v1357_v42  ;;  %v1430_v42 = vld [vmem:[%s2034_s1 + $0x64] ss:$16 sps:$4 sm:$0xff]   ;;  %v1431_v53 = vld [vmem:[%s2034_s1 + $0x6c] ss:$16 sps:$4 sm:$0xff]  }
 0x4f3   :  { %v796_v58 = vmul.f32 %v1361_v55, %v1831_v54  ;;  %v1363_v59 = vpop.eup %1362  ;;  %v1432_v55 = vld [vmem:[%s2034_s1 + $0x60] ss:$16 sps:$4 sm:$0xff]  }
 0x4f5   :  { %v1875_v48 = vadd.f32 %v797_v57, %v796_v58  ;;  %v1434_v57 = vld [vmem:[%s2034_s1 + $0x44] ss:$16 sps:$4 sm:$0xff]   ;;  %v1435_v58 = vld [vmem:[%s2034_s1 + $0x4c] ss:$16 sps:$4 sm:$0xff]  }
 0x4f7   :  { %1364 = vtanh.f32 %v1875_v48 }
 0x504   :  { %v1365_v60 = vpop.eup %1364 }
 0x505   :  { %v800_v61 = vmul.f32 %v1365_v60, %v1363_v59  ;;  %v1437_v59 = vld [vmem:[%s2034_s1 + $0x48] ss:$16 sps:$4 sm:$0xff]   ;;  %v1438_v60 = vld [vmem:[%s2034_s1 + $0x24] ss:$16 sps:$4 sm:$0xff]  }
 0x507   :  { %v808_v62 = vpack.c.bf16 %v800_v61, %v800_v61  ;;  %v1439_v61 = vld [vmem:[%s2034_s1 + $0x2c] ss:$16 sps:$4 sm:$0xff]  }
 0x509   :  { %842 = vmatmul.mubr.bf16.vlgmr.msra.gmra.mxu0 %v808_v62  ;;  %883 = vmatmul.mubr.bf16.vlgmr.msra.gmra.mxu1 %v808_v62  ;;  %v1440_v62 = vld [vmem:[%s2034_s1 + $0x20] ss:$16 sps:$4 sm:$0xff]  }
 0x50a   :  { %928 = vmatpush1.bf16.msra.mxu0 %v1473_v2  ;;  %969 = vmatpush1.bf16.msra.mxu1 %v1501_v7  ;;  %v1414_v2 = vld [vmem:[%s2034_s1 + $0xe4] ss:$16 sps:$4 sm:$0xff]  }
 0x50b   :  { %929 = vmatprep.subr.bf16.mxu0 %v1479_v3  ;;  %970 = vmatprep.subr.bf16.mxu1 %v1520_v10  ;;  %v1415_v3 = vld [vmem:[%s2034_s1 + $0xec] ss:$16 sps:$4 sm:$0xff]  }
 0x50c   :  { %959 = vmatprep.mubr.bf16.mxu0 %v1446_v1  ;;  %1000 = vmatprep.mubr.bf16.mxu1 %v1446_v1 }
 0x50e   :  { %930 = vmatpush1.bf16.msra.mxu0 %v1485_v4  ;;  %971 = vmatpush1.bf16.msra.mxu1 %v1525_v11  ;;  %v1221_v4 = vld [vmem:[%s2035_s0 + $0x50] sm:$0xff] }
 0x50f   :  { %931 = vmatprep.subr.bf16.mxu0 %v1491_v5  ;;  %972 = vmatprep.subr.bf16.mxu1 %v1542_v14  ;;  %v804_v5 = vunpack.c.l.bf16 %v1221_v4  ;;  %v805_v7 = vunpack.c.h.bf16 %v1221_v4  ;;  %v1443_v4 = vld [vmem:[%s2034_s1 + $0xc] ss:$16 sps:$4 sm:$0xff]  }
 0x512   :  { %932 = vmatpush1.bf16.msra.mxu0 %v1507_v8  ;;  %973 = vmatpush1.bf16.msra.mxu1 %v1549_v15 }
 0x513   :  { %933 = vmatprep.subr.bf16.mxu0 %v1514_v9  ;;  %974 = vmatprep.subr.bf16.mxu1 %v1555_v16 }
 0x516   :  { %934 = vmatpush1.bf16.msra.mxu0 %v1532_v12  ;;  %975 = vmatpush1.bf16.msra.mxu1 %v1573_v19 }
 0x517   :  { %935 = vmatprep.subr.bf16.mxu0 %v1537_v13  ;;  %976 = vmatprep.subr.bf16.mxu1 %v1579_v20  ;;  %v1222_v20 = vld [vmem:[%s2035_s0 + $0x58] sm:$0xff] }
 0x51a   :  { %936 = vmatpush1.bf16.msra.mxu0 %v1561_v17  ;;  %977 = vmatpush1.bf16.msra.mxu1 %v1597_v23  ;;  %v806_v23 = vunpack.c.l.bf16 %v1222_v20 }
 0x51b   :  { %937 = vmatprep.subr.bf16.mxu0 %v1567_v18  ;;  %978 = vmatprep.subr.bf16.mxu1 %v1603_v24 }
 0x51e   :  { %938 = vmatpush1.bf16.msra.mxu0 %v1585_v21  ;;  %979 = vmatpush1.bf16.msra.mxu1 %v1621_v27  ;;  %v807_v21 = vunpack.c.h.bf16 %v1222_v20 }
 0x51f   :  { %939 = vmatprep.subr.bf16.mxu0 %v1590_v22  ;;  %980 = vmatprep.subr.bf16.mxu1 %v1627_v28 }
 0x522   :  { %940 = vmatpush1.bf16.msra.mxu0 %v1609_v25  ;;  %981 = vmatpush1.bf16.msra.mxu1 %v1640_v30 }
 0x523   :  { %941 = vmatprep.subr.bf16.mxu0 %v1615_v26  ;;  %982 = vmatprep.subr.bf16.mxu1 %v1646_v31 }
 0x526   :  { %942 = vmatpush1.bf16.msra.mxu0 %v1633_v29  ;;  %983 = vmatpush1.bf16.msra.mxu1 %v1653_v32 }
 0x527   :  { %1045 = vmatprep.subr.bf16.mxu0 %v1414_v2  ;;  %1086 = vmatprep.subr.bf16.mxu1 %v1415_v3  ;;  %v1441_v2 = vld [vmem:[%s2034_s1 + $0x28] ss:$16 sps:$4 sm:$0xff]   ;;  %v1442_v3 = vld [vmem:[%s2034_s1 + $0x4] ss:$16 sps:$4 sm:$0xff]  }
 0x5c9   :  { %v843_v8 = vpop.f32.mrf.mxu0  ;;  %v884_v9 = vpop.f32.mrf.mxu1 }
 0x5ca   :  { %v891_v10 = vadd.f32 %v843_v8, %v804_v5  ;;  %v893_v26 = vadd.f32 %v884_v9, %v806_v23  ;;  %v1444_v5 = vld [vmem:[%s2034_s1] ss:$16 sps:$4 sm:$0xff]   ;;  %v1227_v23 = vld [vmem:[%s2035_s0 + $0x68] sm:$0xff] }
 0x5cb   :  { %v845_v11 = vpop.f32.mrf.mxu0  ;;  %v886_v12 = vpop.f32.mrf.mxu1  ;;  %v1226_v8 = vld [vmem:[%s2035_s0 + $0x60] sm:$0xff] }
 0x5cc   :  { %v1223_v13 = vmul.f32 -1.442695, %v891_v10  ;;  %v892_v14 = vadd.f32 %v845_v11, %v805_v7  ;;  %v894_v22 = vadd.f32 %v886_v12, %v807_v21  ;;  %v1445_v7 = vld [vmem:[%s2034_s1 + $0x8] ss:$16 sps:$4 sm:$0xff]   ;;  %v922_v9 = vunpack.c.l.bf16 %v1226_v8 }
 0x5cd   :  { %v847_v15 = vpop.f32.mrf.mxu0  ;;  %v888_v16 = vpop.f32.mrf.mxu1  ;;  %v923_v10 = vunpack.c.h.bf16 %v1226_v8 }
 0x5ce   :  { %1366 = vpow2.f32 %v1223_v13  ;;  %v1224_v17 = vmul.f32 -1.442695, %v892_v14  ;;  %v1225_v24 = vmul.f32 -1.442695, %v894_v22 }
 0x5cf   :  { %v848_v18 = vpop.f32.mrf.mxu0  ;;  %v889_v19 = vpop.f32.mrf.mxu1 }
 0x5d0   :  { %1368 = vpow2.f32 %v1224_v17 }
 0x5d1   :  { %1370 = vpow2.f32 %v1225_v24  ;;  %v925_v24 = vunpack.c.h.bf16 %v1227_v23 }
 0x5db   :  { %v1367_v25 = vpop.eup %1366 }
 0x5dc   :  { %v898_v27 = vadd.f32 1.0, %v1367_v25 }
 0x5dd   :  { %v1369_v28 = vpop.eup %1368 }
 0x5de   :  { %1372 = vrcp.f32 %v898_v27  ;;  %v904_v29 = vadd.f32 1.0, %v1369_v28  ;;  %v1371_v30 = vpop.eup %1370 }
 0x5df   :  { %1374 = vtanh.f32 %v893_v26  ;;  %v911_v63 = vadd.f32 1.0, %v1371_v30  ;;  %v924_v26 = vunpack.c.l.bf16 %v1227_v23 }
 0x5e0   :  { %1376 = vrcp.f32 %v904_v29 }
 0x5e1   :  { %1378 = vrcp.f32 %v911_v63 }
 0x5eb   :  { %v1373_v31 = vpop.eup %1372 }
 0x5ec   :  { %v1375_v32 = vpop.eup %1374 }
 0x5ed   :  { %v1377_v54 = vpop.eup %1376  ;;  %v915_v33 = vmul.f32 %v1375_v32, %v1373_v31 }
 0x5ee   :  { %v914_v34 = vmul.f32 %v1377_v54, %v1875_v48  ;;  %v1379_v37 = vpop.eup %1378  ;;  %v1436_v48 = vld [vmem:[%s2034_s1 + $0x40] ss:$16 sps:$4 sm:$0xff]  }
 0x5f0   :  { %v1923_v36 = vadd.f32 %v915_v33, %v914_v34 }
 0x5f2   :  { %1380 = vtanh.f32 %v1923_v36 }
 0x5ff   :  { %v1381_v38 = vpop.eup %1380 }
 0x600   :  { %v918_v39 = vmul.f32 %v1381_v38, %v1379_v37 }
 0x602   :  { %v926_v40 = vpack.c.bf16 %v918_v39, %v918_v39 }
 0x604   :  { %960 = vmatmul.mubr.bf16.vlgmr.msra.gmra.mxu0 %v926_v40  ;;  %1001 = vmatmul.mubr.bf16.vlgmr.msra.gmra.mxu1 %v926_v40 }
 0x605   :  { %1046 = vmatpush1.bf16.msra.mxu0 %v1416_v0  ;;  %1087 = vmatpush1.bf16.msra.mxu1 %v1417_v41 }
 0x606   :  { %1047 = vmatprep.subr.bf16.mxu0 %v1418_v6  ;;  %1088 = vmatprep.subr.bf16.mxu1 %v1419_v43 }
 0x607   :  { %1077 = vmatprep.mubr.bf16.mxu0 %v1446_v1  ;;  %1118 = vmatprep.mubr.bf16.mxu1 %v1446_v1  ;;  %v1424_v1 = vld [vmem:[%s2034_s1 + $0xa0] ss:$16 sps:$4 sm:$0xff]  }
 0x609   :  { %1048 = vmatpush1.bf16.msra.mxu0 %v1420_v44  ;;  %1089 = vmatpush1.bf16.msra.mxu1 %v1421_v45  ;;  %v1231_v44 = vld [vmem:[%s2035_s0 + $0x70] sm:$0xff] }
 0x60a   :  { %1049 = vmatprep.subr.bf16.mxu0 %v1422_v46  ;;  %1090 = vmatprep.subr.bf16.mxu1 %v1423_v35  ;;  %v1040_v45 = vunpack.c.l.bf16 %v1231_v44  ;;  %v1041_v46 = vunpack.c.h.bf16 %v1231_v44 }
 0x60d   :  { %1050 = vmatpush1.bf16.msra.mxu0 %v1424_v1  ;;  %1091 = vmatpush1.bf16.msra.mxu1 %v1425_v47 }
 0x60e   :  { %1051 = vmatprep.subr.bf16.mxu0 %v1426_v49  ;;  %1092 = vmatprep.subr.bf16.mxu1 %v1427_v50 }
 0x611   :  { %1052 = vmatpush1.bf16.msra.mxu0 %v1428_v51  ;;  %1093 = vmatpush1.bf16.msra.mxu1 %v1429_v52 }
 0x612   :  { %1053 = vmatprep.subr.bf16.mxu0 %v1430_v42  ;;  %1094 = vmatprep.subr.bf16.mxu1 %v1431_v53 }
 0x615   :  { %1054 = vmatpush1.bf16.msra.mxu0 %v1432_v55  ;;  %1095 = vmatpush1.bf16.msra.mxu1 %v1433_v56 }
 0x616   :  { %1055 = vmatprep.subr.bf16.mxu0 %v1434_v57  ;;  %1096 = vmatprep.subr.bf16.mxu1 %v1435_v58  ;;  %v1232_v57 = vld [vmem:[%s2035_s0 + $0x78] sm:$0xff] }
 0x617   :  { %v1043_v58 = vunpack.c.h.bf16 %v1232_v57 }
 0x619   :  { %1056 = vmatpush1.bf16.msra.mxu0 %v1436_v48  ;;  %1097 = vmatpush1.bf16.msra.mxu1 %v1437_v59  ;;  %v1042_v59 = vunpack.c.l.bf16 %v1232_v57 }
 0x61a   :  { %1057 = vmatprep.subr.bf16.mxu0 %v1438_v60  ;;  %1098 = vmatprep.subr.bf16.mxu1 %v1439_v61 }
 0x61d   :  { %1058 = vmatpush1.bf16.msra.mxu0 %v1440_v62  ;;  %1099 = vmatpush1.bf16.msra.mxu1 %v1441_v2 }
 0x61e   :  { %1059 = vmatprep.subr.bf16.mxu0 %v1442_v3  ;;  %1100 = vmatprep.subr.bf16.mxu1 %v1443_v4 }
 0x621   :  { %1060 = vmatpush1.bf16.msra.mxu0 %v1444_v5  ;;  %1101 = vmatpush1.bf16.msra.mxu1 %v1445_v7 }
 0x6c4   :  { %v961_v11 = vpop.f32.mrf.mxu0  ;;  %v1002_v12 = vpop.f32.mrf.mxu1 }
 0x6c5   :  { %v1009_v13 = vadd.f32 %v961_v11, %v922_v9  ;;  %v1011_v29 = vadd.f32 %v1002_v12, %v924_v26 }
 0x6c6   :  { %v963_v14 = vpop.f32.mrf.mxu0  ;;  %v1004_v15 = vpop.f32.mrf.mxu1 }
 0x6c7   :  { %v1228_v16 = vmul.f32 -1.442695, %v1009_v13  ;;  %v1010_v17 = vadd.f32 %v963_v14, %v923_v10  ;;  %v1012_v25 = vadd.f32 %v1004_v15, %v925_v24 }
 0x6c8   :  { %v965_v18 = vpop.f32.mrf.mxu0  ;;  %v1006_v19 = vpop.f32.mrf.mxu1 }
 0x6c9   :  { %1382 = vpow2.f32 %v1228_v16  ;;  %v1229_v20 = vmul.f32 -1.442695, %v1010_v17  ;;  %v1230_v27 = vmul.f32 -1.442695, %v1012_v25 }
 0x6ca   :  { %v966_v21 = vpop.f32.mrf.mxu0  ;;  %v1007_v22 = vpop.f32.mrf.mxu1 }
 0x6cb   :  { %1384 = vpow2.f32 %v1229_v20 }
 0x6cc   :  { %1386 = vpow2.f32 %v1230_v27 }
 0x6d6   :  { %v1383_v28 = vpop.eup %1382 }
 0x6d7   :  { %v1016_v30 = vadd.f32 1.0, %v1383_v28 }
 0x6d8   :  { %v1385_v31 = vpop.eup %1384 }
 0x6d9   :  { %1388 = vrcp.f32 %v1016_v30  ;;  %v1022_v32 = vadd.f32 1.0, %v1385_v31  ;;  %v1387_v54 = vpop.eup %1386 }
 0x6da   :  { %1390 = vtanh.f32 %v1011_v29  ;;  %v1029_v37 = vadd.f32 1.0, %v1387_v54 }
 0x6db   :  { %1392 = vrcp.f32 %v1022_v32 }
 0x6dc   :  { %1394 = vrcp.f32 %v1029_v37 }
 0x6e6   :  { %v1389_v63 = vpop.eup %1388 }
 0x6e7   :  { %v1391_v33 = vpop.eup %1390 }
 0x6e8   :  { %v1393_v34 = vpop.eup %1392  ;;  %v1033_v38 = vmul.f32 %v1391_v33, %v1389_v63 }
 0x6e9   :  { %v1032_v39 = vmul.f32 %v1393_v34, %v1923_v36  ;;  %v1395_v0 = vpop.eup %1394 }
 0x6eb   :  { %v1034_v40 = vadd.f32 %v1033_v38, %v1032_v39 }
 0x6ed   :  { %1396 = vtanh.f32 %v1034_v40 }
 0x6fa   :  { %v1397_v41 = vpop.eup %1396 }
 0x6fb   :  { %v1036_v6 = vmul.f32 %v1397_v41, %v1395_v0 }
 0x6fd   :  { %v1044_v43 = vpack.c.bf16 %v1036_v6, %v1036_v6 }
 0x6ff   :  { %1078 = vmatmul.mubr.bf16.vlgmr.msra.gmra.mxu0 %v1044_v43  ;;  %1119 = vmatmul.mubr.bf16.vlgmr.msra.gmra.mxu1 %v1044_v43 }
 0x7bf   :  { %v1079_v35 = vpop.f32.mrf.mxu0  ;;  %v1120_v1 = vpop.f32.mrf.mxu1 }
 0x7c0   :  { %v1127_v47 = vadd.f32 %v1079_v35, %v1040_v45  ;;  %v1129_v62 = vadd.f32 %v1120_v1, %v1042_v59 }
 0x7c1   :  { %v1081_v49 = vpop.f32.mrf.mxu0  ;;  %v1122_v36 = vpop.f32.mrf.mxu1 }
 0x7c2   :  { %v1233_v50 = vmul.f32 -1.442695, %v1127_v47  ;;  %v1128_v51 = vadd.f32 %v1081_v49, %v1041_v46  ;;  %v1130_v48 = vadd.f32 %v1122_v36, %v1043_v58 }
 0x7c3   :  { %v1083_v52 = vpop.f32.mrf.mxu0  ;;  %v1124_v42 = vpop.f32.mrf.mxu1 }
 0x7c4   :  { %1398 = vpow2.f32 %v1233_v50  ;;  %v1234_v53 = vmul.f32 -1.442695, %v1128_v51  ;;  %v1235_v60 = vmul.f32 -1.442695, %v1130_v48 }
 0x7c5   :  { %v1084_v55 = vpop.f32.mrf.mxu0  ;;  %v1125_v56 = vpop.f32.mrf.mxu1 }
 0x7c6   :  { %1400 = vpow2.f32 %v1234_v53 }
 0x7c7   :  { %1402 = vpow2.f32 %v1235_v60 }
 0x7d1   :  { %v1399_v61 = vpop.eup %1398 }
 0x7d2   :  { %v1134_v2 = vadd.f32 1.0, %v1399_v61 }
 0x7d3   :  { %v1401_v3 = vpop.eup %1400 }
 0x7d4   :  { %1404 = vrcp.f32 %v1134_v2  ;;  %v1140_v4 = vadd.f32 1.0, %v1401_v3  ;;  %v1403_v5 = vpop.eup %1402 }
 0x7d5   :  { %1406 = vtanh.f32 %v1129_v62  ;;  %v1147_v10 = vadd.f32 1.0, %v1403_v5 }
 0x7d6   :  { %1408 = vrcp.f32 %v1140_v4 }
 0x7d7   :  { %1410 = vrcp.f32 %v1147_v10 }
 0x7e1   :  { %v1405_v7 = vpop.eup %1404 }
 0x7e2   :  { %v1407_v8 = vpop.eup %1406 }
 0x7e3   :  { %v1409_v9 = vpop.eup %1408  ;;  %v1151_v11 = vmul.f32 %v1407_v8, %v1405_v7 }
 0x7e4   :  { %v1150_v12 = vmul.f32 %v1409_v9, %v1034_v40  ;;  %v1411_v14 = vpop.eup %1410 }
 0x7e6   :  { %v1152_v13 = vadd.f32 %v1151_v11, %v1150_v12 }
 0x7e8   :  { %1412 = vtanh.f32 %v1152_v13 }
 0x7f5   :  { %v1413_v15 = vpop.eup %1412 }
 0x7f6   :  { %v1154_v16 = vmul.f32 %v1413_v15, %v1411_v14 }
 0x7f8   :  { %1161 = vst [vmem:[%s2036_s2] sm:$0xff] %v1154_v16 }

</bundles_post_ra>
